<compile_context>
chip_gen: v7x
topology: tpu7x:2x2x1
jax: 0.10.0
libtpu: 0.0.40
codegen_flags: <defaults>
</compile_context>

<pallas_src>
import math
import jax
import jax.numpy as jnp
from jax.experimental import pallas as pl
from jax.experimental.pallas import tpu as pltpu

# ---------------- model config (small, consistent with the module) -----------
B = 2           # batch
S = 8           # sequence length
V = 20          # num_embeddings (vocab)
VP = 32         # vocab padded to a multiple of 8 (zero rows, 8-sublane aligned K)
D = 32          # d_model
H = 4           # nhead
HD = D // H     # head dim
F = 64          # dim_feedforward
L = 16          # latent_dim
NUM_CLS = 1     # num_cls_tokens
assert NUM_CLS == 1   # cross-attention simplification below relies on this
BS = B * S      # batch folded into rows
LN_EPS = 1e-5
NEG_INF = -1e9
PACK_LANES = 128   # packed weight buffer lane width
PAD_V = 128        # vocab projection padded to full lane width (lane-dense store)
ENC_W = 64         # padded width of the [z | mu | log_var | prop] output


# ---------------- packed parameter layout (static, built once) ---------------
def _round8(n):
    return (n + 7) // 8 * 8


def _build_layout():
    entries = [
        ("emb_table", (VP, D)),           # zero-padded vocab rows
        ("pe", (BS, D)),                  # positional encoding pre-tiled over batch
        ("pool", (B, BS)),                # mean-pool matrix (1/S on own-batch cols)
        ("bsel", (BS, B)),                # own-batch selector (broadcast mem -> rows)
        ("sa_mask", (BS, BS)),            # block-diagonal causal mask (0 / -1e9)
        ("w_head", (D, 2 * L)),           # [w_mu | w_lv] (transposed)
        ("b_head", (1, 2 * L)),
        ("w_zp", (L, D + 1)),             # [fc_lat2emb | latent_regressor] merged
        ("b_zp", (1, D + 1)),
        ("sa_in_w", (D, 3 * D)),
        ("sa_in_b", (1, 3 * D)),
        ("sa_out_w", (D, D)),
        ("sa_out_b", (1, D)),
        ("ca_v_w", (D, D)),               # only the V part of cross-attn in_proj
        ("ca_v_b", (1, D)),
        ("ca_out_w", (D, D)),
        ("ca_out_b", (1, D)),
        ("ln1_w", (1, D)), ("ln1_b", (1, D)),
        ("ln2_w", (1, D)), ("ln2_b", (1, D)),
        ("ln3_w", (1, D)), ("ln3_b", (1, D)),
        ("ff_w1", (D, F)),
        ("ff_b1", (1, F)),
        ("ff_w2", (F, D)),
        ("ff_b2", (1, D)),
        ("w_e2a", (D, PAD_V)),            # zero-padded V -> 128 for lane-dense store
        ("b_e2a", (1, PAD_V)),
    ]
    layout, off = {}, 0
    for name, shape in entries:
        layout[name] = (off, shape)
        off += _round8(shape[0])          # 8-sublane aligned slabs -> aligned loads
    return layout, off


LAYOUT, PACK_ROWS = _build_layout()


# ---------------- in-kernel helpers (pure jnp, traced inside Pallas) ---------
def _layernorm(x, w, b):
    # E[x] and E[x^2] are independent cross-lane reductions (var = E[x^2]-E[x]^2).
    m1 = jnp.mean(x, axis=-1, keepdims=True)
    m2 = jnp.mean(x * x, axis=-1, keepdims=True)
    var = m2 - m1 * m1
    return (x - m1) * jax.lax.rsqrt(var + LN_EPS) * w + b


def _softmax(s):
    m = jnp.max(s, axis=-1, keepdims=True)
    e = jnp.exp(s - m)
    return e * pl.reciprocal(jnp.sum(e, axis=-1, keepdims=True), approx=True)


def _bdot(a, b):
    # MXU is bf16-native on v5e/v6e/v7x: bf16 operands, f32 accumulation.
    return jnp.dot(a.astype(jnp.bfloat16), b.astype(jnp.bfloat16),
                   preferred_element_type=jnp.float32)


# ---------------- the single fused kernel ------------------------------------
def vae_fused_kernel(ids_ref, eps_ref, w_ref, logits_ref, enc_ref):
    def slab(name):                                  # static-offset slice of packed weights
        off, (r, c) = LAYOUT[name]
        return w_ref[off:off + r, :c]

    # --- embedding gather: ONE merged one-hot matmul for [x ; shift_right(x)] ---
    vocab_ids = jax.lax.broadcasted_iota(jnp.int32, (2 * BS, VP), 1)
    onehot = jnp.where(vocab_ids == ids_ref[...], 1.0, 0.0)         # idx=-1 -> all-zero SOS row
    emb_tgt = _bdot(onehot, slab("emb_table"))                      # (2*BS, D)
    emb = emb_tgt[:BS]                                              # Embedding(x)
    tgt = emb_tgt[BS:]                                              # shifted-right target

    # --- encoder: mean-pool (pre-packed pooling matrix) + mu/logvar heads + reparam ---
    pooled = _bdot(slab("pool"), emb)                               # (B, D)
    mulv = _bdot(pooled, slab("w_head")) + slab("b_head")           # (B, 2L) = [mu | log_var]
    mu, lv = mulv[:, :L], mulv[:, L:]
    z = mu + eps_ref[...] * jnp.exp(0.5 * lv)                       # reparameterize

    # --- merged z heads: [fc_lat2emb | latent_regressor] in ONE matmul ---
    zp = _bdot(z, slab("w_zp")) + slab("b_zp")                      # (B, D+1)
    mem = zp[:, :D]                                                 # latent memory token per batch
    prop = zp[:, D:D + 1]                                           # predicted property

    # single padded encoder-side output: [z | mu | log_var | prop | 0...]
    enc_ref[...] = jnp.concatenate(
        [z, mulv, prop, jnp.zeros((B, ENC_W - 3 * L - 1), jnp.float32)], axis=-1)

    # --- decoder: one post-norm TransformerDecoderLayer, batch folded into rows ---
    x = tgt + slab("pe")                                            # (BS, D)

    # self-attention: fused QKV projection (1 pass) + static per-head loop.
    qkv = _bdot(x, slab("sa_in_w")) + slab("sa_in_b")               # (BS, 3D)
    qb = (qkv[:, :D] * (1.0 / math.sqrt(HD))).astype(jnp.bfloat16)  # scale q first (PyTorch)
    kb = qkv[:, D:2 * D].astype(jnp.bfloat16)
    vb = qkv[:, 2 * D:].astype(jnp.bfloat16)
    sa_mask = slab("sa_mask")                                       # pre-packed block-diag causal
    heads = []
    for h in range(H):                      # static unrolled; lane slices (Mosaic-safe at HD=8)
        sl = slice(h * HD, (h + 1) * HD)
        s = jax.lax.dot_general(qb[:, sl], kb[:, sl], (((1,), (1,)), ((), ())),
                                preferred_element_type=jnp.float32) + sa_mask
        p = _softmax(s)
        heads.append(jnp.dot(p.astype(jnp.bfloat16), vb[:, sl],
                             preferred_element_type=jnp.float32))
    sa = _bdot(jnp.concatenate(heads, axis=-1), slab("sa_out_w")) + slab("sa_out_b")
    x = _layernorm(x + sa, slab("ln1_w"), slab("ln1_b"))

    # cross-attention over a SINGLE latent memory token per batch: softmax over one
    # key is identically 1 for every head, so it reduces EXACTLY to
    # out_proj(v_proj(mem)) broadcast to the query rows of the same batch.
    v_mem = _bdot(mem, slab("ca_v_w")) + slab("ca_v_b")             # (B, D)
    ca_ctx = _bdot(slab("bsel"), v_mem)                             # (BS, D) own-batch broadcast
    ca = _bdot(ca_ctx, slab("ca_out_w")) + slab("ca_out_b")
    x = _layernorm(x + ca, slab("ln2_w"), slab("ln2_b"))

    # feed-forward (ReLU) + residual + LayerNorm
    h1 = jnp.maximum(_bdot(x, slab("ff_w1")) + slab("ff_b1"), 0.0)
    ff = _bdot(h1, slab("ff_w2")) + slab("ff_b2")
    x = _layernorm(x + ff, slab("ln3_w"), slab("ln3_b"))

    # fc_emb2alp, zero-padded to 128 output lanes -> full-width unmasked store
    logits_ref[...] = _bdot(x, slab("w_e2a")) + slab("b_e2a")


# ---------------- plain-JAX glue: params, PE, packing, wrapper ---------------
def init_params(key):
    ks = jax.random.split(key, 32)
    w = lambda k, shape: (0.1 * jax.random.normal(k, shape)).astype(jnp.float32)
    p = {}
    p['emb_table'] = w(ks[0], (V, D))                       # nn.Embedding(V, D)
    # concrete VAE_Encoder: mean-pool + Linear heads (PyTorch (out, in) layout)
    p['w_mu'] = w(ks[1], (L, D));  p['b_mu'] = w(ks[2], (1, L))
    p['w_lv'] = w(ks[3], (L, D));  p['b_lv'] = w(ks[4], (1, L))
    # latent_regressor: nn.Linear(L, 1)
    p['w_reg'] = w(ks[5], (1, L)); p['b_reg'] = w(ks[6], (1, 1))
    # TransformerDecoder params
    p['w_l2e'] = w(ks[7], (D * NUM_CLS, L)); p['b_l2e'] = w(ks[8], (1, D * NUM_CLS))
    p['sa_in_w'] = w(ks[9], (3 * D, D));  p['sa_in_b'] = w(ks[10], (1, 3 * D))
    p['sa_out_w'] = w(ks[11], (D, D));    p['sa_out_b'] = w(ks[12], (1, D))
    p['ca_in_w'] = w(ks[13], (3 * D, D)); p['ca_in_b'] = w(ks[14], (1, 3 * D))
    p['ca_out_w'] = w(ks[15], (D, D));    p['ca_out_b'] = w(ks[16], (1, D))
    p['ln1_w'] = jnp.ones((1, D), jnp.float32); p['ln1_b'] = jnp.zeros((1, D), jnp.float32)
    p['ln2_w'] = jnp.ones((1, D), jnp.float32); p['ln2_b'] = jnp.zeros((1, D), jnp.float32)
    p['ln3_w'] = jnp.ones((1, D), jnp.float32); p['ln3_b'] = jnp.zeros((1, D), jnp.float32)
    p['ff_w1'] = w(ks[17], (F, D)); p['ff_b1'] = w(ks[18], (1, F))
    p['ff_w2'] = w(ks[19], (D, F)); p['ff_b2'] = w(ks[20], (1, D))
    p['w_e2a'] = w(ks[21], (V, D)); p['b_e2a'] = w(ks[22], (1, V))
    return p


def positional_encoding(seq_len, d_model, c=10000.0):
    double_i = jnp.arange(0, d_model, 2, dtype=jnp.float32)[None, :]
    pos = jnp.arange(seq_len, dtype=jnp.float32)[:, None]
    angle = pos / jnp.power(c, double_i / float(d_model))
    pe = jnp.zeros((seq_len, d_model), jnp.float32)
    pe = pe.at[:, 0::2].set(jnp.sin(angle))
    pe = pe.at[:, 1::2].set(jnp.cos(angle))
    return pe


def pack_params(p):
    """Build the single (PACK_ROWS, 128) weight buffer once at init time.

    PyTorch (out, in) weights are transposed to (in, out); PE is pre-tiled over
    the batch; static mask / pool / selector matrices are pre-built; the vocab
    projection is zero-padded to 128 output lanes and the embedding table to 32
    vocab rows.
    """
    pe = positional_encoding(S, D)

    rows = jnp.arange(BS)[:, None]
    cols = jnp.arange(BS)[None, :]
    sa_mask = jnp.where(((rows // S) == (cols // S)) & (cols <= rows), 0.0, NEG_INF)
    pool = jnp.where(jnp.arange(B)[:, None] == (jnp.arange(BS)[None, :] // S), 1.0 / S, 0.0)
    bsel = jnp.where((jnp.arange(BS)[:, None] // S) == jnp.arange(B)[None, :], 1.0, 0.0)

    vals = {
        "emb_table": jnp.pad(p["emb_table"], ((0, VP - V), (0, 0))),
        "pe": jnp.concatenate([pe] * B, axis=0),
        "pool": pool,
        "bsel": bsel,
        "sa_mask": sa_mask,
        "w_head": jnp.concatenate([p["w_mu"].T, p["w_lv"].T], axis=1),
        "b_head": jnp.concatenate([p["b_mu"], p["b_lv"]], axis=1),
        "w_zp": jnp.concatenate([p["w_l2e"].T, p["w_reg"].T], axis=1),
        "b_zp": jnp.concatenate([p["b_l2e"], p["b_reg"]], axis=1),
        "sa_in_w": p["sa_in_w"].T, "sa_in_b": p["sa_in_b"],
        "sa_out_w": p["sa_out_w"].T, "sa_out_b": p["sa_out_b"],
        "ca_v_w": p["ca_in_w"].T[:, 2 * D:], "ca_v_b": p["ca_in_b"][:, 2 * D:],
        "ca_out_w": p["ca_out_w"].T, "ca_out_b": p["ca_out_b"],
        "ln1_w": p["ln1_w"], "ln1_b": p["ln1_b"],
        "ln2_w": p["ln2_w"], "ln2_b": p["ln2_b"],
        "ln3_w": p["ln3_w"], "ln3_b": p["ln3_b"],
        "ff_w1": p["ff_w1"].T, "ff_b1": p["ff_b1"],
        "ff_w2": p["ff_w2"].T, "ff_b2": p["ff_b2"],
        "w_e2a": jnp.pad(p["w_e2a"].T, ((0, 0), (0, PAD_V - V))),
        "b_e2a": jnp.pad(p["b_e2a"], ((0, 0), (0, PAD_V - V))),
    }
    packed = jnp.zeros((PACK_ROWS, PACK_LANES), jnp.float32)
    for name, (off, (r, c)) in LAYOUT.items():
        v = vals[name].astype(jnp.float32)
        assert v.shape == (r, c), (name, v.shape, (r, c))
        packed = packed.at[off:off + r, :c].set(v)
    return packed


@jax.jit
def transformer_vae_forward(packed, x, eps):
    xi = x.astype(jnp.int32).reshape(BS, 1)
    # shift-right: SOS positions get index -1 -> one-hot row of zeros -> zero embedding
    x_prev = jnp.concatenate(
        [jnp.full((B, 1), -1, jnp.int32), x[:, :-1].astype(jnp.int32)], axis=1)
    xs = x_prev.reshape(BS, 1)
    ids = jnp.concatenate([xi, xs], axis=0)                  # (2*BS, 1): one input DMA

    logits, enc = pl.pallas_call(
        vae_fused_kernel,
        out_shape=(
            jax.ShapeDtypeStruct((BS, PAD_V), jnp.float32),   # lane-dense logits
            jax.ShapeDtypeStruct((B, ENC_W), jnp.float32),    # [z | mu | log_var | prop | 0]
        ),
        compiler_params=pltpu.CompilerParams(vmem_limit_bytes=32 * 1024 * 1024),
    )(ids, eps, packed)

    x_hat = logits[:, :V].reshape(B, S, V)
    z = enc[:, :L]
    mu = enc[:, L:2 * L]
    log_var = enc[:, 2 * L:3 * L]
    pred_prop = enc[:, 3 * L:3 * L + 1]
    return z, mu, log_var, x_hat, pred_prop


if __name__ == "__main__":
    key = jax.random.PRNGKey(0)
    pkey, xkey, ekey = jax.random.split(key, 3)
    params = init_params(pkey)
    packed = pack_params(params)                                    # built once at init
    x = jax.random.randint(xkey, (B, S), 0, V, dtype=jnp.int32)     # (batch, seq) index vectors
    eps = jax.random.normal(ekey, (B, L), dtype=jnp.float32)        # reparameterization noise
    z, mu, log_var, x_hat, pred_prop = transformer_vae_forward(packed, x, eps)
    jax.block_until_ready((z, mu, log_var, x_hat, pred_prop))
    assert z.shape == (B, L) and mu.shape == (B, L) and log_var.shape == (B, L)
    assert x_hat.shape == (B, S, V) and pred_prop.shape == (B, 1)
    assert bool(jnp.all(jnp.isfinite(x_hat))) and bool(jnp.all(jnp.isfinite(pred_prop)))
    print("KERNEL_OK")
</pallas_src>

<mosaic_0001>
module attributes {stable_mosaic.version = 11 : i64} {
  func.func @vae_fused_kernel(%arg0: memref<32x1xi32, #tpu.memory_space<vmem>>, %arg1: memref<2x16xf32, #tpu.memory_space<vmem>>, %arg2: memref<512x128xf32, #tpu.memory_space<vmem>>, %arg3: memref<16x128xf32, #tpu.memory_space<vmem>>, %arg4: memref<2x64xf32, #tpu.memory_space<vmem>>) attributes {dimension_semantics = [], scalar_prefetch = 0 : i64, scratch_operands = 0 : i64, tpu.core_type = #tpu.core_type<tc>} {
    %0 = tpu.iota {dimensions = array<i32: 1>} : vector<32x32xi32>
    %c0 = arith.constant 0 : index
    %c0_0 = arith.constant 0 : index
    %1 = vector.load %arg0[%c0, %c0_0] : memref<32x1xi32, #tpu.memory_space<vmem>>, vector<32x1xi32>
    %2 = vector.broadcast %1 : vector<32x1xi32> to vector<32x32xi32>
    %3 = arith.cmpi eq, %0, %2 : vector<32x32xi32>
    %cst = arith.constant 1.000000e+00 : f32
    %cst_1 = arith.constant 0.000000e+00 : f32
    %4 = vector.broadcast %cst : f32 to vector<32x32xf32>
    %5 = vector.broadcast %cst_1 : f32 to vector<32x32xf32>
    %6 = arith.select %3, %4, %5 : vector<32x32xi1>, vector<32x32xf32>
    %c0_2 = arith.constant 0 : index
    %c0_3 = arith.constant 0 : index
    %7 = vector.load %arg2[%c0_2, %c0_3] : memref<512x128xf32, #tpu.memory_space<vmem>>, vector<32x32xf32>
    %8 = arith.truncf %6 : vector<32x32xf32> to vector<32x32xbf16>
    %9 = arith.truncf %7 : vector<32x32xf32> to vector<32x32xbf16>
    %cst_4 = arith.constant dense<0.000000e+00> : vector<32x32xf32>
    %10 = tpu.matmul %8, %9, %cst_4 {dimension_numbers = #tpu.dot_dimension_numbers<[1], [0], [0], [1], [0, 0, 1, 1], [], []>} : vector<32x32xbf16>, vector<32x32xbf16>, vector<32x32xf32> -> vector<32x32xf32>
    %11 = vector.extract_strided_slice %10 {offsets = [0, 0], sizes = [16, 32], strides = [1, 1]} : vector<32x32xf32> to vector<16x32xf32>
    %12 = vector.extract_strided_slice %10 {offsets = [16, 0], sizes = [16, 32], strides = [1, 1]} : vector<32x32xf32> to vector<16x32xf32>
    %c48 = arith.constant 48 : index
    %c0_5 = arith.constant 0 : index
    %13 = vector.load %arg2[%c48, %c0_5] : memref<512x128xf32, #tpu.memory_space<vmem>>, vector<2x16xf32>
    %14 = arith.truncf %13 : vector<2x16xf32> to vector<2x16xbf16>
    %15 = arith.truncf %11 : vector<16x32xf32> to vector<16x32xbf16>
    %cst_6 = arith.constant dense<0.000000e+00> : vector<2x32xf32>
    %16 = tpu.matmul %14, %15, %cst_6 {dimension_numbers = #tpu.dot_dimension_numbers<[1], [0], [0], [1], [0, 0, 1, 1], [], []>} : vector<2x16xbf16>, vector<16x32xbf16>, vector<2x32xf32> -> vector<2x32xf32>
    %c88 = arith.constant 88 : index
    %c0_7 = arith.constant 0 : index
    %17 = vector.load %arg2[%c88, %c0_7] : memref<512x128xf32, #tpu.memory_space<vmem>>, vector<32x32xf32>
    %18 = arith.truncf %16 : vector<2x32xf32> to vector<2x32xbf16>
    %19 = arith.truncf %17 : vector<32x32xf32> to vector<32x32xbf16>
    %cst_8 = arith.constant dense<0.000000e+00> : vector<2x32xf32>
    %20 = tpu.matmul %18, %19, %cst_8 {dimension_numbers = #tpu.dot_dimension_numbers<[1], [0], [0], [1], [0, 0, 1, 1], [], []>} : vector<2x32xbf16>, vector<32x32xbf16>, vector<2x32xf32> -> vector<2x32xf32>
    %c120 = arith.constant 120 : index
    %c0_9 = arith.constant 0 : index
    %21 = vector.load %arg2[%c120, %c0_9] : memref<512x128xf32, #tpu.memory_space<vmem>>, vector<1x32xf32>
    %22 = vector.broadcast %21 : vector<1x32xf32> to vector<2x32xf32>
    %23 = arith.addf %20, %22 : vector<2x32xf32>
    %24 = vector.extract_strided_slice %23 {offsets = [0, 0], sizes = [2, 16], strides = [1, 1]} : vector<2x32xf32> to vector<2x16xf32>
    %25 = vector.extract_strided_slice %23 {offsets = [0, 16], sizes = [2, 16], strides = [1, 1]} : vector<2x32xf32> to vector<2x16xf32>
    %c0_10 = arith.constant 0 : index
    %c0_11 = arith.constant 0 : index
    %26 = vector.load %arg1[%c0_10, %c0_11] : memref<2x16xf32, #tpu.memory_space<vmem>>, vector<2x16xf32>
    %cst_12 = arith.constant 5.000000e-01 : f32
    %27 = vector.broadcast %cst_12 : f32 to vector<2x16xf32>
    %28 = arith.mulf %27, %25 : vector<2x16xf32>
    %29 = math.exp %28 : vector<2x16xf32>
    %30 = arith.mulf %26, %29 : vector<2x16xf32>
    %31 = arith.addf %24, %30 : vector<2x16xf32>
    %c128 = arith.constant 128 : index
    %c0_13 = arith.constant 0 : index
    %32 = vector.load %arg2[%c128, %c0_13] : memref<512x128xf32, #tpu.memory_space<vmem>>, vector<16x33xf32>
    %33 = arith.truncf %31 : vector<2x16xf32> to vector<2x16xbf16>
    %34 = arith.truncf %32 : vector<16x33xf32> to vector<16x33xbf16>
    %cst_14 = arith.constant dense<0.000000e+00> : vector<2x33xf32>
    %35 = tpu.matmul %33, %34, %cst_14 {dimension_numbers = #tpu.dot_dimension_numbers<[1], [0], [0], [1], [0, 0, 1, 1], [], []>} : vector<2x16xbf16>, vector<16x33xbf16>, vector<2x33xf32> -> vector<2x33xf32>
    %c144 = arith.constant 144 : index
    %c0_15 = arith.constant 0 : index
    %36 = vector.load %arg2[%c144, %c0_15] : memref<512x128xf32, #tpu.memory_space<vmem>>, vector<1x33xf32>
    %37 = vector.broadcast %36 : vector<1x33xf32> to vector<2x33xf32>
    %38 = arith.addf %35, %37 : vector<2x33xf32>
    %39 = vector.extract_strided_slice %38 {offsets = [0, 0], sizes = [2, 32], strides = [1, 1]} : vector<2x33xf32> to vector<2x32xf32>
    %40 = vector.extract_strided_slice %38 {offsets = [0, 32], sizes = [2, 1], strides = [1, 1]} : vector<2x33xf32> to vector<2x1xf32>
    %cst_16 = arith.constant 0.000000e+00 : f32
    %41 = vector.broadcast %cst_16 : f32 to vector<2x15xf32>
    %42 = tpu.concatenate %31, %23, %40, %41 in 1 : vector<2x16xf32>, vector<2x32xf32>, vector<2x1xf32>, vector<2x15xf32> -> vector<2x64xf32>
    %c0_17 = arith.constant 0 : index
    %c0_18 = arith.constant 0 : index
    %43 = vector.load %arg4[%c0_17, %c0_18] : memref<2x64xf32, #tpu.memory_space<vmem>>, vector<2x64xf32>
    tpu.vector_store %arg4[%c0_17, %c0_18], %42 {strides = array<i32>} : memref<2x64xf32, #tpu.memory_space<vmem>>, vector<2x64xf32>,
    %c32 = arith.constant 32 : index
    %c0_19 = arith.constant 0 : index
    %44 = vector.load %arg2[%c32, %c0_19] : memref<512x128xf32, #tpu.memory_space<vmem>>, vector<16x32xf32>
    %45 = arith.addf %12, %44 : vector<16x32xf32>
    %c152 = arith.constant 152 : index
    %c0_20 = arith.constant 0 : index
    %46 = vector.load %arg2[%c152, %c0_20] : memref<512x128xf32, #tpu.memory_space<vmem>>, vector<32x96xf32>
    %47 = arith.truncf %45 : vector<16x32xf32> to vector<16x32xbf16>
    %48 = arith.truncf %46 : vector<32x96xf32> to vector<32x96xbf16>
    %cst_21 = arith.constant dense<0.000000e+00> : vector<16x96xf32>
    %49 = tpu.matmul %47, %48, %cst_21 {dimension_numbers = #tpu.dot_dimension_numbers<[1], [0], [0], [1], [0, 0, 1, 1], [], []>} : vector<16x32xbf16>, vector<32x96xbf16>, vector<16x96xf32> -> vector<16x96xf32>
    %c184 = arith.constant 184 : index
    %c0_22 = arith.constant 0 : index
    %50 = vector.load %arg2[%c184, %c0_22] : memref<512x128xf32, #tpu.memory_space<vmem>>, vector<1x96xf32>
    %51 = vector.broadcast %50 : vector<1x96xf32> to vector<16x96xf32>
    %52 = arith.addf %49, %51 : vector<16x96xf32>
    %53 = vector.extract_strided_slice %52 {offsets = [0, 0], sizes = [16, 32], strides = [1, 1]} : vector<16x96xf32> to vector<16x32xf32>
    %cst_23 = arith.constant 0.353553385 : f32
    %54 = vector.broadcast %cst_23 : f32 to vector<16x32xf32>
    %55 = arith.mulf %53, %54 : vector<16x32xf32>
    %56 = arith.truncf %55 : vector<16x32xf32> to vector<16x32xbf16>
    %57 = vector.extract_strided_slice %52 {offsets = [0, 32], sizes = [16, 32], strides = [1, 1]} : vector<16x96xf32> to vector<16x32xf32>
    %58 = arith.truncf %57 : vector<16x32xf32> to vector<16x32xbf16>
    %59 = vector.extract_strided_slice %52 {offsets = [0, 64], sizes = [16, 32], strides = [1, 1]} : vector<16x96xf32> to vector<16x32xf32>
    %60 = arith.truncf %59 : vector<16x32xf32> to vector<16x32xbf16>
    %c72 = arith.constant 72 : index
    %c0_24 = arith.constant 0 : index
    %61 = vector.load %arg2[%c72, %c0_24] : memref<512x128xf32, #tpu.memory_space<vmem>>, vector<16x16xf32>
    %62 = vector.extract_strided_slice %56 {offsets = [0, 0], sizes = [16, 8], strides = [1, 1]} : vector<16x32xbf16> to vector<16x8xbf16>
    %63 = vector.extract_strided_slice %58 {offsets = [0, 0], sizes = [16, 8], strides = [1, 1]} : vector<16x32xbf16> to vector<16x8xbf16>
    %cst_25 = arith.constant dense<0.000000e+00> : vector<16x16xf32>
    %64 = tpu.matmul %62, %63, %cst_25 {dimension_numbers = #tpu.dot_dimension_numbers<[1], [1], [0], [0], [0, 0, 1, 0], [], []>} : vector<16x8xbf16>, vector<16x8xbf16>, vector<16x16xf32> -> vector<16x16xf32>
    %65 = arith.addf %64, %61 : vector<16x16xf32>
    %cst_26 = arith.constant dense<0xFF800000> : vector<16xf32>
    %66 = vector.multi_reduction <maximumf>, %65, %cst_26 [1] : vector<16x16xf32> to vector<16xf32>
    %67 = vector.shape_cast %66 : vector<16xf32> to vector<16x1xf32>
    %68 = vector.broadcast %67 : vector<16x1xf32> to vector<16x16xf32>
    %69 = arith.subf %65, %68 : vector<16x16xf32>
    %70 = math.exp %69 : vector<16x16xf32>
    %cst_27 = arith.constant dense<0.000000e+00> : vector<16xf32>
    %71 = vector.multi_reduction <add>, %70, %cst_27 [1] : vector<16x16xf32> to vector<16xf32>
    %72 = vector.shape_cast %71 : vector<16xf32> to vector<16x1xf32>
    %73 = tpu.reciprocal %72 {approx = true} : vector<16x1xf32> -> vector<16x1xf32>
    %74 = vector.broadcast %73 : vector<16x1xf32> to vector<16x16xf32>
    %75 = arith.mulf %70, %74 : vector<16x16xf32>
    %76 = arith.truncf %75 : vector<16x16xf32> to vector<16x16xbf16>
    %77 = vector.extract_strided_slice %60 {offsets = [0, 0], sizes = [16, 8], strides = [1, 1]} : vector<16x32xbf16> to vector<16x8xbf16>
    %cst_28 = arith.constant dense<0.000000e+00> : vector<16x8xf32>
    %78 = tpu.matmul %76, %77, %cst_28 {dimension_numbers = #tpu.dot_dimension_numbers<[1], [0], [0], [1], [0, 0, 1, 1], [], []>} : vector<16x16xbf16>, vector<16x8xbf16>, vector<16x8xf32> -> vector<16x8xf32>
    %79 = vector.extract_strided_slice %56 {offsets = [0, 8], sizes = [16, 8], strides = [1, 1]} : vector<16x32xbf16> to vector<16x8xbf16>
    %80 = vector.extract_strided_slice %58 {offsets = [0, 8], sizes = [16, 8], strides = [1, 1]} : vector<16x32xbf16> to vector<16x8xbf16>
    %cst_29 = arith.constant dense<0.000000e+00> : vector<16x16xf32>
    %81 = tpu.matmul %79, %80, %cst_29 {dimension_numbers = #tpu.dot_dimension_numbers<[1], [1], [0], [0], [0, 0, 1, 0], [], []>} : vector<16x8xbf16>, vector<16x8xbf16>, vector<16x16xf32> -> vector<16x16xf32>
    %82 = arith.addf %81, %61 : vector<16x16xf32>
    %cst_30 = arith.constant dense<0xFF800000> : vector<16xf32>
    %83 = vector.multi_reduction <maximumf>, %82, %cst_30 [1] : vector<16x16xf32> to vector<16xf32>
    %84 = vector.shape_cast %83 : vector<16xf32> to vector<16x1xf32>
    %85 = vector.broadcast %84 : vector<16x1xf32> to vector<16x16xf32>
    %86 = arith.subf %82, %85 : vector<16x16xf32>
    %87 = math.exp %86 : vector<16x16xf32>
    %cst_31 = arith.constant dense<0.000000e+00> : vector<16xf32>
    %88 = vector.multi_reduction <add>, %87, %cst_31 [1] : vector<16x16xf32> to vector<16xf32>
    %89 = vector.shape_cast %88 : vector<16xf32> to vector<16x1xf32>
    %90 = tpu.reciprocal %89 {approx = true} : vector<16x1xf32> -> vector<16x1xf32>
    %91 = vector.broadcast %90 : vector<16x1xf32> to vector<16x16xf32>
    %92 = arith.mulf %87, %91 : vector<16x16xf32>
    %93 = arith.truncf %92 : vector<16x16xf32> to vector<16x16xbf16>
    %94 = vector.extract_strided_slice %60 {offsets = [0, 8], sizes = [16, 8], strides = [1, 1]} : vector<16x32xbf16> to vector<16x8xbf16>
    %cst_32 = arith.constant dense<0.000000e+00> : vector<16x8xf32>
    %95 = tpu.matmul %93, %94, %cst_32 {dimension_numbers = #tpu.dot_dimension_numbers<[1], [0], [0], [1], [0, 0, 1, 1], [], []>} : vector<16x16xbf16>, vector<16x8xbf16>, vector<16x8xf32> -> vector<16x8xf32>
    %96 = vector.extract_strided_slice %56 {offsets = [0, 16], sizes = [16, 8], strides = [1, 1]} : vector<16x32xbf16> to vector<16x8xbf16>
    %97 = vector.extract_strided_slice %58 {offsets = [0, 16], sizes = [16, 8], strides = [1, 1]} : vector<16x32xbf16> to vector<16x8xbf16>
    %cst_33 = arith.constant dense<0.000000e+00> : vector<16x16xf32>
    %98 = tpu.matmul %96, %97, %cst_33 {dimension_numbers = #tpu.dot_dimension_numbers<[1], [1], [0], [0], [0, 0, 1, 0], [], []>} : vector<16x8xbf16>, vector<16x8xbf16>, vector<16x16xf32> -> vector<16x16xf32>
    %99 = arith.addf %98, %61 : vector<16x16xf32>
    %cst_34 = arith.constant dense<0xFF800000> : vector<16xf32>
    %100 = vector.multi_reduction <maximumf>, %99, %cst_34 [1] : vector<16x16xf32> to vector<16xf32>
    %101 = vector.shape_cast %100 : vector<16xf32> to vector<16x1xf32>
    %102 = vector.broadcast %101 : vector<16x1xf32> to vector<16x16xf32>
    %103 = arith.subf %99, %102 : vector<16x16xf32>
    %104 = math.exp %103 : vector<16x16xf32>
    %cst_35 = arith.constant dense<0.000000e+00> : vector<16xf32>
    %105 = vector.multi_reduction <add>, %104, %cst_35 [1] : vector<16x16xf32> to vector<16xf32>
    %106 = vector.shape_cast %105 : vector<16xf32> to vector<16x1xf32>
    %107 = tpu.reciprocal %106 {approx = true} : vector<16x1xf32> -> vector<16x1xf32>
    %108 = vector.broadcast %107 : vector<16x1xf32> to vector<16x16xf32>
    %109 = arith.mulf %104, %108 : vector<16x16xf32>
    %110 = arith.truncf %109 : vector<16x16xf32> to vector<16x16xbf16>
    %111 = vector.extract_strided_slice %60 {offsets = [0, 16], sizes = [16, 8], strides = [1, 1]} : vector<16x32xbf16> to vector<16x8xbf16>
    %cst_36 = arith.constant dense<0.000000e+00> : vector<16x8xf32>
    %112 = tpu.matmul %110, %111, %cst_36 {dimension_numbers = #tpu.dot_dimension_numbers<[1], [0], [0], [1], [0, 0, 1, 1], [], []>} : vector<16x16xbf16>, vector<16x8xbf16>, vector<16x8xf32> -> vector<16x8xf32>
    %113 = vector.extract_strided_slice %56 {offsets = [0, 24], sizes = [16, 8], strides = [1, 1]} : vector<16x32xbf16> to vector<16x8xbf16>
    %114 = vector.extract_strided_slice %58 {offsets = [0, 24], sizes = [16, 8], strides = [1, 1]} : vector<16x32xbf16> to vector<16x8xbf16>
    %cst_37 = arith.constant dense<0.000000e+00> : vector<16x16xf32>
    %115 = tpu.matmul %113, %114, %cst_37 {dimension_numbers = #tpu.dot_dimension_numbers<[1], [1], [0], [0], [0, 0, 1, 0], [], []>} : vector<16x8xbf16>, vector<16x8xbf16>, vector<16x16xf32> -> vector<16x16xf32>
    %116 = arith.addf %115, %61 : vector<16x16xf32>
    %cst_38 = arith.constant dense<0xFF800000> : vector<16xf32>
    %117 = vector.multi_reduction <maximumf>, %116, %cst_38 [1] : vector<16x16xf32> to vector<16xf32>
    %118 = vector.shape_cast %117 : vector<16xf32> to vector<16x1xf32>
    %119 = vector.broadcast %118 : vector<16x1xf32> to vector<16x16xf32>
    %120 = arith.subf %116, %119 : vector<16x16xf32>
    %121 = math.exp %120 : vector<16x16xf32>
    %cst_39 = arith.constant dense<0.000000e+00> : vector<16xf32>
    %122 = vector.multi_reduction <add>, %121, %cst_39 [1] : vector<16x16xf32> to vector<16xf32>
    %123 = vector.shape_cast %122 : vector<16xf32> to vector<16x1xf32>
    %124 = tpu.reciprocal %123 {approx = true} : vector<16x1xf32> -> vector<16x1xf32>
    %125 = vector.broadcast %124 : vector<16x1xf32> to vector<16x16xf32>
    %126 = arith.mulf %121, %125 : vector<16x16xf32>
    %127 = arith.truncf %126 : vector<16x16xf32> to vector<16x16xbf16>
    %128 = vector.extract_strided_slice %60 {offsets = [0, 24], sizes = [16, 8], strides = [1, 1]} : vector<16x32xbf16> to vector<16x8xbf16>
    %cst_40 = arith.constant dense<0.000000e+00> : vector<16x8xf32>
    %129 = tpu.matmul %127, %128, %cst_40 {dimension_numbers = #tpu.dot_dimension_numbers<[1], [0], [0], [1], [0, 0, 1, 1], [], []>} : vector<16x16xbf16>, vector<16x8xbf16>, vector<16x8xf32> -> vector<16x8xf32>
    %130 = tpu.concatenate %78, %95, %112, %129 in 1 : vector<16x8xf32>, vector<16x8xf32>, vector<16x8xf32>, vector<16x8xf32> -> vector<16x32xf32>
    %c192 = arith.constant 192 : index
    %c0_41 = arith.constant 0 : index
    %131 = vector.load %arg2[%c192, %c0_41] : memref<512x128xf32, #tpu.memory_space<vmem>>, vector<32x32xf32>
    %132 = arith.truncf %130 : vector<16x32xf32> to vector<16x32xbf16>
    %133 = arith.truncf %131 : vector<32x32xf32> to vector<32x32xbf16>
    %cst_42 = arith.constant dense<0.000000e+00> : vector<16x32xf32>
    %134 = tpu.matmul %132, %133, %cst_42 {dimension_numbers = #tpu.dot_dimension_numbers<[1], [0], [0], [1], [0, 0, 1, 1], [], []>} : vector<16x32xbf16>, vector<32x32xbf16>, vector<16x32xf32> -> vector<16x32xf32>
    %c224 = arith.constant 224 : index
    %c0_43 = arith.constant 0 : index
    %135 = vector.load %arg2[%c224, %c0_43] : memref<512x128xf32, #tpu.memory_space<vmem>>, vector<1x32xf32>
    %136 = vector.broadcast %135 : vector<1x32xf32> to vector<16x32xf32>
    %137 = arith.addf %134, %136 : vector<16x32xf32>
    %138 = arith.addf %45, %137 : vector<16x32xf32>
    %c312 = arith.constant 312 : index
    %c0_44 = arith.constant 0 : index
    %139 = vector.load %arg2[%c312, %c0_44] : memref<512x128xf32, #tpu.memory_space<vmem>>, vector<1x32xf32>
    %c320 = arith.constant 320 : index
    %c0_45 = arith.constant 0 : index
    %140 = vector.load %arg2[%c320, %c0_45] : memref<512x128xf32, #tpu.memory_space<vmem>>, vector<1x32xf32>
    %cst_46 = arith.constant dense<0.000000e+00> : vector<16xf32>
    %141 = vector.multi_reduction <add>, %138, %cst_46 [1] : vector<16x32xf32> to vector<16xf32>
    %142 = vector.shape_cast %141 : vector<16xf32> to vector<16x1xf32>
    %cst_47 = arith.constant 3.200000e+01 : f32
    %143 = vector.broadcast %cst_47 : f32 to vector<16x1xf32>
    %144 = arith.divf %142, %143 : vector<16x1xf32>
    %145 = arith.mulf %138, %138 : vector<16x32xf32>
    %cst_48 = arith.constant dense<0.000000e+00> : vector<16xf32>
    %146 = vector.multi_reduction <add>, %145, %cst_48 [1] : vector<16x32xf32> to vector<16xf32>
    %147 = vector.shape_cast %146 : vector<16xf32> to vector<16x1xf32>
    %cst_49 = arith.constant 3.200000e+01 : f32
    %148 = vector.broadcast %cst_49 : f32 to vector<16x1xf32>
    %149 = arith.divf %147, %148 : vector<16x1xf32>
    %150 = arith.mulf %144, %144 : vector<16x1xf32>
    %151 = arith.subf %149, %150 : vector<16x1xf32>
    %152 = vector.broadcast %144 : vector<16x1xf32> to vector<16x32xf32>
    %153 = arith.subf %138, %152 : vector<16x32xf32>
    %cst_50 = arith.constant 9.99999974E-6 : f32
    %154 = vector.broadcast %cst_50 : f32 to vector<16x1xf32>
    %155 = arith.addf %151, %154 : vector<16x1xf32>
    %156 = math.rsqrt %155 : vector<16x1xf32>
    %157 = vector.broadcast %156 : vector<16x1xf32> to vector<16x32xf32>
    %158 = arith.mulf %153, %157 : vector<16x32xf32>
    %159 = vector.broadcast %139 : vector<1x32xf32> to vector<16x32xf32>
    %160 = arith.mulf %158, %159 : vector<16x32xf32>
    %161 = vector.broadcast %140 : vector<1x32xf32> to vector<16x32xf32>
    %162 = arith.addf %160, %161 : vector<16x32xf32>
    %c232 = arith.constant 232 : index
    %c0_51 = arith.constant 0 : index
    %163 = vector.load %arg2[%c232, %c0_51] : memref<512x128xf32, #tpu.memory_space<vmem>>, vector<32x32xf32>
    %164 = arith.truncf %39 : vector<2x32xf32> to vector<2x32xbf16>
    %165 = arith.truncf %163 : vector<32x32xf32> to vector<32x32xbf16>
    %cst_52 = arith.constant dense<0.000000e+00> : vector<2x32xf32>
    %166 = tpu.matmul %164, %165, %cst_52 {dimension_numbers = #tpu.dot_dimension_numbers<[1], [0], [0], [1], [0, 0, 1, 1], [], []>} : vector<2x32xbf16>, vector<32x32xbf16>, vector<2x32xf32> -> vector<2x32xf32>
    %c264 = arith.constant 264 : index
    %c0_53 = arith.constant 0 : index
    %167 = vector.load %arg2[%c264, %c0_53] : memref<512x128xf32, #tpu.memory_space<vmem>>, vector<1x32xf32>
    %168 = vector.broadcast %167 : vector<1x32xf32> to vector<2x32xf32>
    %169 = arith.addf %166, %168 : vector<2x32xf32>
    %c56 = arith.constant 56 : index
    %c0_54 = arith.constant 0 : index
    %170 = vector.load %arg2[%c56, %c0_54] : memref<512x128xf32, #tpu.memory_space<vmem>>, vector<16x2xf32>
    %171 = arith.truncf %170 : vector<16x2xf32> to vector<16x2xbf16>
    %172 = arith.truncf %169 : vector<2x32xf32> to vector<2x32xbf16>
    %cst_55 = arith.constant dense<0.000000e+00> : vector<16x32xf32>
    %173 = tpu.matmul %171, %172, %cst_55 {dimension_numbers = #tpu.dot_dimension_numbers<[1], [0], [0], [1], [0, 0, 1, 1], [], []>} : vector<16x2xbf16>, vector<2x32xbf16>, vector<16x32xf32> -> vector<16x32xf32>
    %c272 = arith.constant 272 : index
    %c0_56 = arith.constant 0 : index
    %174 = vector.load %arg2[%c272, %c0_56] : memref<512x128xf32, #tpu.memory_space<vmem>>, vector<32x32xf32>
    %175 = arith.truncf %173 : vector<16x32xf32> to vector<16x32xbf16>
    %176 = arith.truncf %174 : vector<32x32xf32> to vector<32x32xbf16>
    %cst_57 = arith.constant dense<0.000000e+00> : vector<16x32xf32>
    %177 = tpu.matmul %175, %176, %cst_57 {dimension_numbers = #tpu.dot_dimension_numbers<[1], [0], [0], [1], [0, 0, 1, 1], [], []>} : vector<16x32xbf16>, vector<32x32xbf16>, vector<16x32xf32> -> vector<16x32xf32>
    %c304 = arith.constant 304 : index
    %c0_58 = arith.constant 0 : index
    %178 = vector.load %arg2[%c304, %c0_58] : memref<512x128xf32, #tpu.memory_space<vmem>>, vector<1x32xf32>
    %179 = vector.broadcast %178 : vector<1x32xf32> to vector<16x32xf32>
    %180 = arith.addf %177, %179 : vector<16x32xf32>
    %181 = arith.addf %162, %180 : vector<16x32xf32>
    %c328 = arith.constant 328 : index
    %c0_59 = arith.constant 0 : index
    %182 = vector.load %arg2[%c328, %c0_59] : memref<512x128xf32, #tpu.memory_space<vmem>>, vector<1x32xf32>
    %c336 = arith.constant 336 : index
    %c0_60 = arith.constant 0 : index
    %183 = vector.load %arg2[%c336, %c0_60] : memref<512x128xf32, #tpu.memory_space<vmem>>, vector<1x32xf32>
    %cst_61 = arith.constant dense<0.000000e+00> : vector<16xf32>
    %184 = vector.multi_reduction <add>, %181, %cst_61 [1] : vector<16x32xf32> to vector<16xf32>
    %185 = vector.shape_cast %184 : vector<16xf32> to vector<16x1xf32>
    %cst_62 = arith.constant 3.200000e+01 : f32
    %186 = vector.broadcast %cst_62 : f32 to vector<16x1xf32>
    %187 = arith.divf %185, %186 : vector<16x1xf32>
    %188 = arith.mulf %181, %181 : vector<16x32xf32>
    %cst_63 = arith.constant dense<0.000000e+00> : vector<16xf32>
    %189 = vector.multi_reduction <add>, %188, %cst_63 [1] : vector<16x32xf32> to vector<16xf32>
    %190 = vector.shape_cast %189 : vector<16xf32> to vector<16x1xf32>
    %cst_64 = arith.constant 3.200000e+01 : f32
    %191 = vector.broadcast %cst_64 : f32 to vector<16x1xf32>
    %192 = arith.divf %190, %191 : vector<16x1xf32>
    %193 = arith.mulf %187, %187 : vector<16x1xf32>
    %194 = arith.subf %192, %193 : vector<16x1xf32>
    %195 = vector.broadcast %187 : vector<16x1xf32> to vector<16x32xf32>
    %196 = arith.subf %181, %195 : vector<16x32xf32>
    %cst_65 = arith.constant 9.99999974E-6 : f32
    %197 = vector.broadcast %cst_65 : f32 to vector<16x1xf32>
    %198 = arith.addf %194, %197 : vector<16x1xf32>
    %199 = math.rsqrt %198 : vector<16x1xf32>
    %200 = vector.broadcast %199 : vector<16x1xf32> to vector<16x32xf32>
    %201 = arith.mulf %196, %200 : vector<16x32xf32>
    %202 = vector.broadcast %182 : vector<1x32xf32> to vector<16x32xf32>
    %203 = arith.mulf %201, %202 : vector<16x32xf32>
    %204 = vector.broadcast %183 : vector<1x32xf32> to vector<16x32xf32>
    %205 = arith.addf %203, %204 : vector<16x32xf32>
    %c360 = arith.constant 360 : index
    %c0_66 = arith.constant 0 : index
    %206 = vector.load %arg2[%c360, %c0_66] : memref<512x128xf32, #tpu.memory_space<vmem>>, vector<32x64xf32>
    %207 = arith.truncf %205 : vector<16x32xf32> to vector<16x32xbf16>
    %208 = arith.truncf %206 : vector<32x64xf32> to vector<32x64xbf16>
    %cst_67 = arith.constant dense<0.000000e+00> : vector<16x64xf32>
    %209 = tpu.matmul %207, %208, %cst_67 {dimension_numbers = #tpu.dot_dimension_numbers<[1], [0], [0], [1], [0, 0, 1, 1], [], []>} : vector<16x32xbf16>, vector<32x64xbf16>, vector<16x64xf32> -> vector<16x64xf32>
    %c392 = arith.constant 392 : index
    %c0_68 = arith.constant 0 : index
    %210 = vector.load %arg2[%c392, %c0_68] : memref<512x128xf32, #tpu.memory_space<vmem>>, vector<1x64xf32>
    %211 = vector.broadcast %210 : vector<1x64xf32> to vector<16x64xf32>
    %212 = arith.addf %209, %211 : vector<16x64xf32>
    %cst_69 = arith.constant 0.000000e+00 : f32
    %213 = vector.broadcast %cst_69 : f32 to vector<16x64xf32>
    %214 = arith.maximumf %212, %213 : vector<16x64xf32>
    %c400 = arith.constant 400 : index
    %c0_70 = arith.constant 0 : index
    %215 = vector.load %arg2[%c400, %c0_70] : memref<512x128xf32, #tpu.memory_space<vmem>>, vector<64x32xf32>
    %216 = arith.truncf %214 : vector<16x64xf32> to vector<16x64xbf16>
    %217 = arith.truncf %215 : vector<64x32xf32> to vector<64x32xbf16>
    %cst_71 = arith.constant dense<0.000000e+00> : vector<16x32xf32>
    %218 = tpu.matmul %216, %217, %cst_71 {dimension_numbers = #tpu.dot_dimension_numbers<[1], [0], [0], [1], [0, 0, 1, 1], [], []>} : vector<16x64xbf16>, vector<64x32xbf16>, vector<16x32xf32> -> vector<16x32xf32>
    %c464 = arith.constant 464 : index
    %c0_72 = arith.constant 0 : index
    %219 = vector.load %arg2[%c464, %c0_72] : memref<512x128xf32, #tpu.memory_space<vmem>>, vector<1x32xf32>
    %220 = vector.broadcast %219 : vector<1x32xf32> to vector<16x32xf32>
    %221 = arith.addf %218, %220 : vector<16x32xf32>
    %222 = arith.addf %205, %221 : vector<16x32xf32>
    %c344 = arith.constant 344 : index
    %c0_73 = arith.constant 0 : index
    %223 = vector.load %arg2[%c344, %c0_73] : memref<512x128xf32, #tpu.memory_space<vmem>>, vector<1x32xf32>
    %c352 = arith.constant 352 : index
    %c0_74 = arith.constant 0 : index
    %224 = vector.load %arg2[%c352, %c0_74] : memref<512x128xf32, #tpu.memory_space<vmem>>, vector<1x32xf32>
    %cst_75 = arith.constant dense<0.000000e+00> : vector<16xf32>
    %225 = vector.multi_reduction <add>, %222, %cst_75 [1] : vector<16x32xf32> to vector<16xf32>
    %226 = vector.shape_cast %225 : vector<16xf32> to vector<16x1xf32>
    %cst_76 = arith.constant 3.200000e+01 : f32
    %227 = vector.broadcast %cst_76 : f32 to vector<16x1xf32>
    %228 = arith.divf %226, %227 : vector<16x1xf32>
    %229 = arith.mulf %222, %222 : vector<16x32xf32>
    %cst_77 = arith.constant dense<0.000000e+00> : vector<16xf32>
    %230 = vector.multi_reduction <add>, %229, %cst_77 [1] : vector<16x32xf32> to vector<16xf32>
    %231 = vector.shape_cast %230 : vector<16xf32> to vector<16x1xf32>
    %cst_78 = arith.constant 3.200000e+01 : f32
    %232 = vector.broadcast %cst_78 : f32 to vector<16x1xf32>
    %233 = arith.divf %231, %232 : vector<16x1xf32>
    %234 = arith.mulf %228, %228 : vector<16x1xf32>
    %235 = arith.subf %233, %234 : vector<16x1xf32>
    %236 = vector.broadcast %228 : vector<16x1xf32> to vector<16x32xf32>
    %237 = arith.subf %222, %236 : vector<16x32xf32>
    %cst_79 = arith.constant 9.99999974E-6 : f32
    %238 = vector.broadcast %cst_79 : f32 to vector<16x1xf32>
    %239 = arith.addf %235, %238 : vector<16x1xf32>
    %240 = math.rsqrt %239 : vector<16x1xf32>
    %241 = vector.broadcast %240 : vector<16x1xf32> to vector<16x32xf32>
    %242 = arith.mulf %237, %241 : vector<16x32xf32>
    %243 = vector.broadcast %223 : vector<1x32xf32> to vector<16x32xf32>
    %244 = arith.mulf %242, %243 : vector<16x32xf32>
    %245 = vector.broadcast %224 : vector<1x32xf32> to vector<16x32xf32>
    %246 = arith.addf %244, %245 : vector<16x32xf32>
    %c472 = arith.constant 472 : index
    %c0_80 = arith.constant 0 : index
    %247 = vector.load %arg2[%c472, %c0_80] : memref<512x128xf32, #tpu.memory_space<vmem>>, vector<32x128xf32>
    %248 = arith.truncf %246 : vector<16x32xf32> to vector<16x32xbf16>
    %249 = arith.truncf %247 : vector<32x128xf32> to vector<32x128xbf16>
    %cst_81 = arith.constant dense<0.000000e+00> : vector<16x128xf32>
    %250 = tpu.matmul %248, %249, %cst_81 {dimension_numbers = #tpu.dot_dimension_numbers<[1], [0], [0], [1], [0, 0, 1, 1], [], []>} : vector<16x32xbf16>, vector<32x128xbf16>, vector<16x128xf32> -> vector<16x128xf32>
    %c504 = arith.constant 504 : index
    %c0_82 = arith.constant 0 : index
    %251 = vector.load %arg2[%c504, %c0_82] : memref<512x128xf32, #tpu.memory_space<vmem>>, vector<1x128xf32>
    %252 = vector.broadcast %251 : vector<1x128xf32> to vector<16x128xf32>
    %253 = arith.addf %250, %252 : vector<16x128xf32>
    %c0_83 = arith.constant 0 : index
    %c0_84 = arith.constant 0 : index
    %254 = vector.load %arg3[%c0_83, %c0_84] : memref<16x128xf32, #tpu.memory_space<vmem>>, vector<16x128xf32>
    tpu.vector_store %arg3[%c0_83, %c0_84], %253 {strides = array<i32>} : memref<16x128xf32, #tpu.memory_space<vmem>>, vector<16x128xf32>,
    return
  }
}

</mosaic_0001>

<bundles_post_ra>
// kernel: transformer_vae_forward.1
= control target key start
LH: loop header
LB: loop body
LE: loop exit
PB: predicated region body
PF: predicated region fallthrough
CT: control target
= control target key end

     0   :  { %10 = vsyncpa [#allocation3], 0  ;;  %s1765_s15 = smov [#allocation2]   ;;  %s2017_s0 = inlined_call_operand.vmem [shape: s32[32,1], index: 0, kind: input, shape index: {}]   ;;  %s2018_s1 = inlined_call_operand.vmem [shape: f32[2,16], index: 1, kind: input, shape index: {}]   ;;  %s2019_s2 = inlined_call_operand.hbm [shape: f32[512,128], index: 2, kind: input, shape index: {}]   ;;  %s2020_s3 = inlined_call_operand.vmem [shape: f32[16,128], index: 3, kind: output, shape index: {0}]   ;;  %s2021_s4 = inlined_call_operand.vmem [shape: f32[2,64], index: 4, kind: output, shape index: {1}]  }
   0x1   :  { %s20_s16 = sshll.u32 %s1765_s15, 4  ;;  %s1741_s19 = scalar_lea.hbm %s2019_s2, 8192  ;;  %s21_s16 = int_to_ptr.vmem [resolvable:$true] %s20_s16 }
   0x2   :  { %p1742_p0 = scmp.ne.s32.totalorder %s2019_s2, %s1741_s19  ;;  %p1745_p1 = scmp.lt.u32.totalorder %s1741_s19, %s2019_s2 }
   0x4   :  { %p1747_p2 = pnand %p1745_p1, %p1742_p0 }
   0x6   :  { %1750 = shalt.err (!%p1747_p2)
}
   0x7   :  { %s1751_s24 = scalar_lea.vmem %s21_s16, 8192  ;;  %p1756_p4 = scmp.lt.s32.totalorder %s21_s16, %s21_s16 }
   0x8   :  { %p1752_p3 = scmp.ne.s32.totalorder %s21_s16, %s1751_s24  ;;  %p1757_p5 = scmp.lt.s32.totalorder %s1751_s24, %s1751_s24 }
   0xa   :  { %p1758_p6 = por %p1757_p5, %p1756_p4 }
   0xc   :  { %p1759_p7 = pnand %p1758_p6, %p1752_p3 }
   0xe   :  { %1762 = shalt.err (!%p1759_p7)
}
   0xf   :  { %s1766_s25 = smov 128   ;;  %s1767_s26 = smov 8  }
  0x10   :  { %26 = dma.hbm_to_vmem [thread:$0]  %s2019_s2, 8192, %s21_s16, [#allocation3], %s1766_s25, %s1766_s25, %s1767_s26  }
  0x11   :  { %1763 = dma.done.wait [#allocation3], 8192  }
  0x12   :  { %1764 = vsyncadd [#allocation3], 4294959104  ;;  %v1768_v0 = vmov 0   ;;  %v1769_v1 = vmov 0.0   ;;  %v35_v2 = vld [vmem:[%s2017_s0 + $0x10] sm:$0xff]  ;;  %v33_v3 = vld [vmem:[%s2017_s0] sm:$0xff]  ;;  %v31_v12 = vlaneseq }
  0x13   :  { %1679 = vset.pattern.permute.xlu1 %v1768_v0  ;;  %1678 = vset.pattern.permute.xlu0 %v1768_v0  ;;  %v57_v4 = vld [vmem:[#allocation2] sm:$0xff]  ;;  %v58_v5 = vld [vmem:[#allocation2 + $0x8] sm:$0xff]  ;;  %v36_v6 = vld [vmem:[%s2017_s0 + $0x18] sm:$0xff]  ;;  %vm65_vm4 = vcmask 261120   ;;  %vm1770_vm5 = vmmov 0   ;;  %vm124_vm6 = vcmask 130048  }
  0x14   :  { %1525 = vmatprep.subr.bf16.mxu1 %v1769_v1  ;;  %44 = vperm.xlu1 %1679, %v35_v2   ;;  %v34_v7 = vld [vmem:[%s2017_s0 + $0x8] sm:$0xff]  ;;  %v63_v8 = vpack.c.bf16 %v58_v5, %v57_v4  ;;  %v59_v9 = vld [vmem:[#allocation2 + $0x10] sm:$0xff]  ;;  %v60_v10 = vld [vmem:[#allocation2 + $0x18] sm:$0xff]  ;;  %v32_v13 = vand.u32 127, %v31_v12  ;;  %s1771_s0 = smov 96   ;;  %s1772_s10 = smov 112  }
  0x15   :  { %38 = vperm.xlu0 %1678, %v33_v3   ;;  %v64_v11 = vpack.c.bf16 %v60_v10, %v59_v9  ;;  %1527 = vmatprep.mubr.msk.bf16.mxu1 %vm1770_vm5, %v1769_v1  ;;  %v121_v27 = vld [vmem:[#allocation2 + $0x30] sm:$0x3]  ;;  %v168_v29 = vld [vmem:[#allocation2 + $0x58] sm:$0xff]  ;;  %v169_v30 = vld [vmem:[#allocation2 + $0x60] sm:$0xff]  ;;  %s1773_s11 = smov 120   ;;  %s1774_s12 = smov 88  }
  0x16   :  { %1517 = vmatprep.subr.bf16.mxu0 %v63_v8  ;;  %v122_v32 = vpack.c.bf16 %v121_v27, %v121_v27  ;;  %v173_v33 = vpack.c.bf16 %v169_v30, %v168_v29  ;;  %v170_v34 = vld [vmem:[#allocation2 + $0x68] sm:$0xff]  ;;  %v171_v35 = vld [vmem:[#allocation2 + $0x70] sm:$0xff]  ;;  %v304_v37 = vld [vmem:[#allocation2 + $0x98] sm:$0xff]  ;;  %s1775_s13 = smov 80   ;;  %s1776_s14 = smov 104   ;;  %vm369_vm7 = vcmask 64512  }
  0x17   :  { %1518 = vmatpush3.bf16.msra.mxu0 %v63_v8  ;;  %v174_v36 = vpack.c.bf16 %v171_v35, %v170_v34  ;;  %v305_v38 = vld [vmem:[#allocation2 + $0xa0] sm:$0xff]  ;;  %v306_v43 = vld [vmem:[#allocation2 + $0xa8] sm:$0xff]  ;;  %v307_v44 = vld [vmem:[#allocation2 + $0xb0] sm:$0xff]  ;;  %s1777_s15 = smov 72   ;;  %s1779_s18 = smov 48   ;;  %vm879_vm8 = vcmask 195584  }
  0x18   :  { %47 = vperm.xlu1 %1679, %v36_v6   ;;  %1519 = vmatprep.subr.bf16.mxu0 %v64_v11  ;;  %v309_v40 = vpack.c.bf16 %v305_v38, %v304_v37  ;;  %v301_v45 = vld [vmem:[#allocation2 + $0x28] sm:$0xff]  ;;  %v300_v48 = vld [vmem:[#allocation2 + $0x20] sm:$0xff]  ;;  %v310_v49 = vpack.c.bf16 %v307_v44, %v306_v43  ;;  %v1432_v53 = vld [vmem:[#allocation2 + $0x78] ss:$0 sm:$0xff]  ;;  %s1780_s19 = smov 40   ;;  %s1781_s20 = smov 56  }
  0x19   :  { %41 = vperm.xlu0 %1678, %v34_v7   ;;  %v233_v54 = vld [vmem:[#allocation2 + $0x80] sm:$0xff]  ;;  %v234_v55 = vld [vmem:[#allocation2 + $0x88] sm:$0xff]  ;;  %v1436_v0 = vld [vmem:[#allocation2 + $0xb8] ss:$0 sm:$0xff]  ;;  %s1782_s21 = smov 16   ;;  %s1783_s22 = smov 24  }
  0x1a   :  { %v236_v57 = vpack.c.bf16 %v234_v55, %v233_v54  ;;  %v365_v35 = vld [vmem:[#allocation2 + $0x50] sm:$0xff]  ;;  %vm1048_vm9 = vcmask 1040384   ;;  %vm1044_vm10 = vcmask 15360   ;;  %vm1271_vm11 = vcmask 523264  }
  0x1b   :  { %1520 = vmatpush3.bf16.msra.mxu0 %v64_v11  ;;  %vm294_vm12 = vcmask 392192   ;;  %vm296_vm13 = vcmask 400384   ;;  %vm298_vm14 = vcmask 517120  }
  0x1c   :  { %1539 = vmatprep.subr.bf16.mxu0 %v1769_v1 }
  0x93   :  { %v45_v14 = vpop.permute.xlu1 %44 }
  0x94   :  { %v39_v15 = vpop.permute.xlu0 %38  ;;  %vm51_vm0 = vcmp.eq.s32.totalorder %v32_v13, %v45_v14 }
  0x95   :  { %vm49_vm1 = vcmp.eq.s32.totalorder %v32_v13, %v39_v15  ;;  %v55_v18 = vsel %vm51_vm0, 1.0, %v1769_v1 }
  0x96   :  { %v53_v19 = vsel %vm49_vm1, 1.0, %v1769_v1 }
  0x97   :  { %v48_v16 = vpop.permute.xlu1 %47 }
  0x98   :  { %v42_v17 = vpop.permute.xlu0 %41  ;;  %vm52_vm2 = vcmp.eq.s32.totalorder %v32_v13, %v48_v16 }
  0x99   :  { %vm50_vm3 = vcmp.eq.s32.totalorder %v32_v13, %v42_v17  ;;  %v56_v20 = vsel %vm52_vm2, 1.0, %v1769_v1  ;;  %v223_v13 = vld [vmem:[%s2018_s1] sm:$0x3]  ;;  %s1778_s1 = smov 64  }
  0x9a   :  { %v54_v21 = vsel %vm50_vm3, 1.0, %v1769_v1  ;;  %v62_v22 = vpack.c.bf16 %v56_v20, %v55_v18 }
  0x9b   :  { %v61_v23 = vpack.c.bf16 %v54_v21, %v53_v19 }
  0x9d   :  { %1521 = vmatprep.mubr.msk.bf16.mxu0 %vm65_vm4, %v61_v23 }
  0x9e   :  { %1522 = vmatmul.mubr.msk.bf16.vlgmr.msra.gmra.mrb[0].mxu0 %vm65_vm4, %v62_v22 }
  0x9f   :  { %1541 = vmatprep.mubr.msk.bf16.mxu0 %vm1770_vm5, %v1769_v1  ;;  %1540 = vmatpush3.bf16.msra.mxu0 %v236_v57 }
  0xa0   :  { %1553 = vmatprep.subr.bf16.mxu0 %v1769_v1 }
 0x171   :  { %v1523_v24 = vpop.f32.mrb[0].mxu0 }
 0x172   :  { %v106_v25 = vpop.f32.mrb[1].mxu0  ;;  %v1858_v51 = vadd.f32 %v1523_v24, %v300_v48 }
 0x173   :  { %v1524_v26 = vpop.f32.mrb[2].mxu0 }
 0x174   :  { %v109_v28 = vpop.f32.mrb[3].mxu0  ;;  %v1855_v50 = vadd.f32 %v1524_v26, %v301_v45 }
 0x175   :  { %v123_v31 = vpack.c.bf16 %v109_v28, %v106_v25 }
 0x176   :  { %v308_v52 = vpack.c.bf16 %v1855_v50, %v1858_v51 }
 0x177   :  { %1526 = vmatpush3.bf16.msra.mxu1 %v123_v31 }
 0x178   :  { %1531 = vmatprep.subr.bf16.mxu1 %v1769_v1 }
 0x17a   :  { %1528 = vmatmul.mubr.msk.bf16.vlgmr.msra.gmra.mrb[0].mxu1 %vm124_vm6, %v122_v32 }
 0x17b   :  { %1532 = vmatpush3.bf16.msra.mxu1 %v173_v33  ;;  %1535 = vmatprep.mubr.msk.bf16.mxu1 %vm1770_vm5, %v1769_v1  ;;  %v364_v33 = vld [vmem:[#allocation2 + $0x48] sm:$0xff] }
 0x17c   :  { %1533 = vmatprep.subr.bf16.mxu1 %v1769_v1 }
 0x17f   :  { %1534 = vmatpush3.bf16.msra.mxu1 %v174_v36 }
 0x180   :  { %1545 = vmatprep.subr.bf16.mxu1 %v1769_v1 }
 0x24d   :  { %v162_v39 = vpop.f32.mrb[0].mxu1 }
 0x24e   :  { %v172_v41 = vpack.c.bf16 %v162_v39, %v162_v39  ;;  %v1529_v42 = vpop.f32.mrb[1].mxu1 }
 0x24f   :  { %v165_v46 = vpop.f32.mrb[2].mxu1 }
 0x250   :  { %v1530_v47 = vpop.f32.mrb[3].mxu1  ;;  %1536 = vmatmul.mubr.msk.bf16.vlgmr.msra.gmra.mrb[4].mxu1 %vm65_vm4, %v172_v41 }
 0x251   :  { %1546 = vmatpush3.bf16.msra.mxu1 %v309_v40  ;;  %1549 = vmatprep.mubr.msk.bf16.mxu1 %vm1770_vm5, %v1769_v1 }
 0x252   :  { %1547 = vmatprep.subr.bf16.mxu1 %v1769_v1 }
 0x255   :  { %1548 = vmatpush3.bf16.msra.mxu1 %v310_v49 }
 0x256   :  { %1559 = vmatprep.subr.bf16.mxu1 %v1769_v1 }
 0x258   :  { %1550 = vmatmul.mubr.msk.bf16.vlgmr.msra.gmra.mrb[8].mxu1 %vm65_vm4, %v308_v52 }
 0x259   :  { %1561 = vmatprep.mubr.msk.bf16.mxu1 %vm1770_vm5, %v1769_v1 }
 0x323   :  { %v217_v56 = vpop.f32.mrb[4].mxu1 }
 0x324   :  { %v1866_v58 = vadd.f32 %v1432_v53, %v217_v56  ;;  %v1537_v59 = vpop.f32.mrb[5].mxu1 }
 0x325   :  { %v220_v60 = vpop.f32.mrb[6].mxu1 }
 0x326   :  { %v224_v61 = vmul.f32 0.5, %v1866_v58  ;;  %v1538_v62 = vpop.f32.mrb[7].mxu1 }
 0x328   :  { %v225_v63 = vmul.f32 1.442695, %v224_v61 }
 0x32a   :  { %1695 = vpow2.f32 %v225_v63 }
 0x32b   :  { %v353_v2 = vpop.f32.mrb[8].mxu1 }
 0x32c   :  { %v354_v3 = vadd.f32 %v1436_v0, %v353_v2  ;;  %v1551_v4 = vpop.f32.mrb[9].mxu1 }
 0x32d   :  { %v356_v5 = vpop.f32.mrb[10].mxu1 }
 0x32e   :  { %v357_v6 = vadd.f32 %v1436_v0, %v356_v5  ;;  %v1552_v7 = vpop.f32.mrb[11].mxu1  ;;  %v360_v8 = vmul.f32 0.35355338, %v354_v3 }
 0x330   :  { %v361_v9 = vmul.f32 0.35355338, %v357_v6  ;;  %v1870_v10 = vpack.c.bf16 %v357_v6, %v354_v3 }
 0x332   :  { %v362_v11 = vpack.c.bf16 %v361_v9, %v360_v8  ;;  %367 = vrot.lane.b32.xlu1 %v1870_v10, %s1771_s0 }
 0x334   :  { %v1696_v12 = vpop.eup %1695 }
 0x335   :  { %228 = vrot.lane.b32.xlu0 %v1696_v12, %s1772_s10 }
 0x336   :  { %488 = vrot.lane.b32.xlu1 %v362_v11, %s1773_s11 }
 0x339   :  { %490 = vrot.lane.b32.xlu0 %v1870_v10, %s1774_s12 }
 0x33a   :  { %609 = vrot.lane.b32.xlu1 %v362_v11, %s1772_s10 }
 0x33d   :  { %611 = vrot.lane.b32.xlu0 %v1870_v10, %s1775_s13 }
 0x33e   :  { %730 = vrot.lane.b32.xlu1 %v362_v11, %s1776_s14 }
 0x341   :  { %732 = vrot.lane.b32.xlu0 %v1870_v10, %s1777_s15 }
 0x3a4   :  { %v368_v17 = vpop.permute.xlu1 %367 }
 0x3a5   :  { %v374_v19 = vsel %vm369_vm7, %v368_v17, 0 }
 0x3a7   :  { %v229_v14 = vpop.permute.xlu0 %228 }
 0x3a8   :  { %v231_v15 = vmul.f32 %v229_v14, %v223_v13  ;;  %v489_v23 = vpop.permute.xlu1 %488 }
 0x3aa   :  { %v1880_v16 = vadd.f32 %v231_v15, %v1866_v58 }
 0x3ab   :  { %v491_v20 = vpop.permute.xlu0 %490 }
 0x3ac   :  { %v235_v18 = vpack.c.bf16 %v1880_v16, %v1880_v16  ;;  %v496_v21 = vsel %vm369_vm7, %v491_v20, 0  ;;  %v610_v26 = vpop.permute.xlu1 %609 }
 0x3ae   :  { %1542 = vmatmul.mubr.msk.bf16.vlgmr.msra.gmra.mrb[4].mxu0 %vm124_vm6, %v235_v18 }
 0x3af   :  { %1554 = vmatpush3.bf16.xpose.msra.mxu0 %v374_v19  ;;  %1555 = vmatprep.mubr.msk.bf16.mxu0 %vm1770_vm5, %v1769_v1  ;;  %v612_v22 = vpop.permute.xlu0 %611 }
 0x3b0   :  { %1565 = vmatprep.subr.bf16.mxu0 %v1769_v1  ;;  %v617_v24 = vsel %vm369_vm7, %v612_v22, 0  ;;  %v731_v28 = vpop.permute.xlu1 %730 }
 0x3b3   :  { %v733_v25 = vpop.permute.xlu0 %732 }
 0x3b4   :  { %v738_v27 = vsel %vm369_vm7, %v733_v25, 0 }
 0x3b6   :  { %1556 = vmatmul.mubr.msk.bf16.vlgmr.msra.gmra.mrb[8].mxu0 %vm369_vm7, %v362_v11 }
 0x3b7   :  { %1566 = vmatpush3.bf16.xpose.msra.mxu0 %v496_v21  ;;  %1567 = vmatprep.mubr.msk.bf16.mxu0 %vm1770_vm5, %v1769_v1 }
 0x3b8   :  { %1577 = vmatprep.subr.bf16.mxu0 %v1769_v1 }
 0x3be   :  { %1568 = vmatmul.mubr.msk.bf16.vlgmr.msra.gmra.mrb[12].mxu0 %vm369_vm7, %v489_v23 }
 0x3bf   :  { %1578 = vmatpush3.bf16.xpose.msra.mxu0 %v617_v24  ;;  %1579 = vmatprep.mubr.msk.bf16.mxu0 %vm1770_vm5, %v1769_v1 }
 0x3c0   :  { %1589 = vmatprep.subr.bf16.mxu0 %v1769_v1 }
 0x3c6   :  { %1580 = vmatmul.mubr.msk.bf16.vlgmr.msra.gmra.mrb[16].mxu0 %vm369_vm7, %v610_v26 }
 0x3c7   :  { %1590 = vmatpush3.bf16.xpose.msra.mxu0 %v738_v27  ;;  %1591 = vmatprep.mubr.msk.bf16.mxu0 %vm1770_vm5, %v1769_v1 }
 0x3c8   :  { %1601 = vmatprep.subr.bf16.mxu0 %v1769_v1 }
 0x3ce   :  { %1592 = vmatmul.mubr.msk.bf16.vlgmr.msra.gmra.mrb[20].mxu0 %vm369_vm7, %v731_v28 }
 0x3cf   :  { %1605 = vmatprep.mubr.msk.bf16.mxu0 %vm1770_vm5, %v1769_v1 }
 0x481   :  { %v1907_v29 = vpop.f32.mrb[4].mxu0 }
 0x482   :  { %v1543_v30 = vpop.f32.mrb[5].mxu0 }
 0x483   :  { %v282_v31 = vpop.f32.mrb[6].mxu0 }
 0x484   :  { %v1544_v32 = vpop.f32.mrb[7].mxu0 }
 0x489   :  { %v410_v34 = vpop.f32.mrb[8].mxu0 }
 0x48a   :  { %v411_v36 = vadd.f32 %v410_v34, %v364_v33  ;;  %v1557_v37 = vpop.f32.mrb[9].mxu0 }
 0x48b   :  { %v413_v38 = vpop.f32.mrb[10].mxu0 }
 0x48c   :  { %v414_v39 = vadd.f32 %v413_v38, %v365_v35  ;;  %v1558_v40 = vpop.f32.mrb[11].mxu0  ;;  %v417_v41 = vsel %vm124_vm6, %v411_v36, -inf }
 0x48d   :  { %418 = vmax.xlane.f32.xlu0 %v417_v41 }
 0x48e   :  { %v420_v42 = vsel %vm124_vm6, %v414_v39, -inf }
 0x48f   :  { %421 = vmax.xlane.f32.xlu1 %v420_v42 }
 0x491   :  { %v532_v43 = vpop.f32.mrb[12].mxu0 }
 0x492   :  { %v533_v44 = vadd.f32 %v532_v43, %v364_v33  ;;  %v1569_v45 = vpop.f32.mrb[13].mxu0 }
 0x493   :  { %v535_v46 = vpop.f32.mrb[14].mxu0 }
 0x494   :  { %v536_v47 = vadd.f32 %v535_v46, %v365_v35  ;;  %v1570_v48 = vpop.f32.mrb[15].mxu0  ;;  %v539_v49 = vsel %vm124_vm6, %v533_v44, -inf }
 0x495   :  { %540 = vmax.xlane.f32.xlu0 %v539_v49 }
 0x496   :  { %v542_v52 = vsel %vm124_vm6, %v536_v47, -inf }
 0x499   :  { %543 = vmax.xlane.f32.xlu0 %v542_v52  ;;  %v653_v53 = vpop.f32.mrb[16].mxu0 }
 0x49a   :  { %v654_v54 = vadd.f32 %v653_v53, %v364_v33  ;;  %v1581_v55 = vpop.f32.mrb[17].mxu0 }
 0x49b   :  { %v656_v56 = vpop.f32.mrb[18].mxu0 }
 0x49c   :  { %v657_v57 = vadd.f32 %v656_v56, %v365_v35  ;;  %v1582_v59 = vpop.f32.mrb[19].mxu0  ;;  %v660_v60 = vsel %vm124_vm6, %v654_v54, -inf }
 0x49d   :  { %661 = vmax.xlane.f32.xlu1 %v660_v60 }
 0x49e   :  { %v663_v61 = vsel %vm124_vm6, %v657_v57, -inf }
 0x49f   :  { %664 = vmax.xlane.f32.xlu0 %v663_v61 }
 0x4a1   :  { %v774_v62 = vpop.f32.mrb[20].mxu0 }
 0x4a2   :  { %v775_v63 = vadd.f32 %v774_v62, %v364_v33  ;;  %v1593_v0 = vpop.f32.mrb[21].mxu0 }
 0x4a3   :  { %v777_v2 = vpop.f32.mrb[22].mxu0 }
 0x4a4   :  { %v778_v3 = vadd.f32 %v777_v2, %v365_v35  ;;  %v1594_v4 = vpop.f32.mrb[23].mxu0  ;;  %v781_v5 = vsel %vm124_vm6, %v775_v63, -inf }
 0x4a5   :  { %782 = vmax.xlane.f32.xlu1 %v781_v5 }
 0x4a6   :  { %v784_v6 = vsel %vm124_vm6, %v778_v3, -inf }
 0x4a7   :  { %785 = vmax.xlane.f32.xlu0 %v784_v6 }
 0x4b6   :  { %440 = vrot.lane.b32.xlu1 %v1870_v10, %s1778_s1 }
 0x51a   :  { %v419_v7 = vpop.xlane.xlu0 %418 }
 0x51b   :  { %v423_v8 = vsub.f32 %v411_v36, %v419_v7 }
 0x51c   :  { %v422_v9 = vpop.xlane.xlu1 %421 }
 0x51d   :  { %v425_v11 = vmul.f32 1.442695, %v423_v8  ;;  %v424_v12 = vsub.f32 %v414_v39, %v422_v9 }
 0x51f   :  { %1697 = vpow2.f32 %v425_v11  ;;  %v427_v13 = vmul.f32 1.442695, %v424_v12 }
 0x521   :  { %1699 = vpow2.f32 %v427_v13 }
 0x522   :  { %v541_v14 = vpop.xlane.xlu0 %540 }
 0x523   :  { %v545_v15 = vsub.f32 %v533_v44, %v541_v14 }
 0x525   :  { %v547_v17 = vmul.f32 1.442695, %v545_v15 }
 0x526   :  { %v544_v18 = vpop.xlane.xlu0 %543 }
 0x527   :  { %1701 = vpow2.f32 %v547_v17  ;;  %v546_v19 = vsub.f32 %v536_v47, %v544_v18 }
 0x529   :  { %v1698_v20 = vpop.eup %1697  ;;  %v549_v21 = vmul.f32 1.442695, %v546_v19 }
 0x52a   :  { %v662_v22 = vpop.xlane.xlu1 %661  ;;  %v429_v23 = vsel %vm124_vm6, %v1698_v20, 0.0 }
 0x52b   :  { %v1700_v24 = vpop.eup %1699  ;;  %1703 = vpow2.f32 %v549_v21  ;;  %v666_v25 = vsub.f32 %v654_v54, %v662_v22  ;;  %430 = vadd.xlane.f32.xlu1 %v429_v23  ;;  %v985_v21 = vld [vmem:[#allocation2 + $0xe8] sm:$0xff]  ;;  %v986_v22 = vld [vmem:[#allocation2 + $0xf0] sm:$0xff] }
 0x52c   :  { %v665_v26 = vpop.xlane.xlu0 %664  ;;  %v432_v27 = vsel %vm124_vm6, %v1700_v24, 0.0 }
 0x52d   :  { %v668_v28 = vmul.f32 1.442695, %v666_v25  ;;  %v667_v30 = vsub.f32 %v657_v57, %v665_v26  ;;  %433 = vadd.xlane.f32.xlu0 %v432_v27  ;;  %v987_v26 = vld [vmem:[#allocation2 + $0xf8] sm:$0xff]  ;;  %v988_v27 = vld [vmem:[#allocation2 + $0x100] sm:$0xff] }
 0x52f   :  { %1705 = vpow2.f32 %v668_v28  ;;  %v670_v31 = vmul.f32 1.442695, %v667_v30  ;;  %v1434_v28 = vld [vmem:[#allocation2 + $0x90] ss:$0 sm:$0xff]  ;;  %v991_v30 = vpack.c.bf16 %v988_v27, %v987_v26  ;;  %v1094_v26 = vld [vmem:[#allocation2 + $0x118] sm:$0xff] }
 0x531   :  { %v1702_v32 = vpop.eup %1701  ;;  %1707 = vpow2.f32 %v670_v31  ;;  %v1950_v31 = vadd.f32 %v1434_v28, %v1907_v29  ;;  %v1095_v28 = vld [vmem:[#allocation2 + $0x120] sm:$0xff] }
 0x532   :  { %v783_v33 = vpop.xlane.xlu1 %782  ;;  %v551_v34 = vsel %vm124_vm6, %v1702_v32, 0.0 }
 0x533   :  { %v787_v35 = vsub.f32 %v775_v63, %v783_v33  ;;  %552 = vadd.xlane.f32.xlu1 %v551_v34 }
 0x534   :  { %v786_v36 = vpop.xlane.xlu0 %785 }
 0x535   :  { %v1704_v37 = vpop.eup %1703  ;;  %v789_v38 = vmul.f32 1.442695, %v787_v35  ;;  %v788_v39 = vsub.f32 %v778_v3, %v786_v36 }
 0x536   :  { %v441_v40 = vpop.permute.xlu1 %440  ;;  %v554_v41 = vsel %vm124_vm6, %v1704_v37, 0.0 }
 0x537   :  { %1709 = vpow2.f32 %v789_v38  ;;  %v791_v42 = vmul.f32 1.442695, %v788_v39  ;;  %1560 = vmatpush3.bf16.msra.mxu1 %v441_v40  ;;  %555 = vadd.xlane.f32.xlu0 %v554_v41  ;;  %v882_v39 = vld [vmem:[#allocation2 + $0xc0] sm:$0xff]  ;;  %v883_v40 = vld [vmem:[#allocation2 + $0xc8] sm:$0xff] }
 0x538   :  { %1571 = vmatprep.subr.bf16.mxu1 %v1769_v1 }
 0x539   :  { %v1706_v43 = vpop.eup %1705  ;;  %1711 = vpow2.f32 %v791_v42 }
 0x53a   :  { %v672_v44 = vsel %vm124_vm6, %v1706_v43, 0.0 }
 0x53b   :  { %v1708_v45 = vpop.eup %1707  ;;  %673 = vadd.xlane.f32.xlu1 %v672_v44  ;;  %v884_v44 = vld [vmem:[#allocation2 + $0xd0] sm:$0xff] }
 0x53c   :  { %v675_v46 = vsel %vm124_vm6, %v1708_v45, 0.0 }
 0x53d   :  { %676 = vadd.xlane.f32.xlu0 %v675_v46 }
 0x541   :  { %v1925_v47 = vpop.eup %1709 }
 0x542   :  { %v793_v48 = vsel %vm124_vm6, %v1925_v47, 0.0 }
 0x543   :  { %v1712_v49 = vpop.eup %1711  ;;  %794 = vadd.xlane.f32.xlu1 %v793_v48 }
 0x544   :  { %v796_v52 = vsel %vm124_vm6, %v1712_v49, 0.0 }
 0x545   :  { %797 = vadd.xlane.f32.xlu0 %v796_v52 }
 0x554   :  { %683 = vrot.lane.b32.xlu1 %v1870_v10, %s1779_s18 }
 0x558   :  { %804 = vrot.lane.b32.xlu1 %v1870_v10, %s1780_s19 }
 0x55b   :  { %562 = vrot.lane.b32.xlu0 %v1870_v10, %s1781_s20 }
 0x5b8   :  { %v431_v53 = vpop.xlane.xlu1 %430 }
 0x5b9   :  { %1713 = vrcp.f32 %v431_v53 }
 0x5ba   :  { %v434_v54 = vpop.xlane.xlu0 %433 }
 0x5bb   :  { %1715 = vrcp.f32 %v434_v54 }
 0x5c0   :  { %v553_v61 = vpop.xlane.xlu1 %552 }
 0x5c3   :  { %v1714_v55 = vpop.eup %1713 }
 0x5c4   :  { %v556_v56 = vpop.xlane.xlu0 %555  ;;  %v437_v59 = vmul.f32 %v1714_v55, %v1698_v20 }
 0x5c5   :  { %v1716_v57 = vpop.eup %1715  ;;  %1717 = vrcp.f32 %v556_v56 }
 0x5c6   :  { %v438_v60 = vmul.f32 %v1716_v57, %v1700_v24  ;;  %1719 = vrcp.f32 %v553_v61  ;;  %v990_v24 = vpack.c.bf16 %v986_v22, %v985_v21  ;;  %v1040_v22 = vld [vmem:[#allocation2 + $0x38] sm:$0xff] }
 0x5c8   :  { %v439_v62 = vpack.c.bf16 %v438_v60, %v437_v59  ;;  %v674_v10 = vpop.xlane.xlu1 %673 }
 0x5ca   :  { %1562 = vmatmul.mubr.msk.bf16.vlgmr.msra.gmra.mrb[12].mxu1 %vm124_vm6, %v439_v62  ;;  %v677_v63 = vpop.xlane.xlu0 %676 }
 0x5cb   :  { %1573 = vmatprep.mubr.msk.bf16.mxu1 %vm1770_vm5, %v1769_v1  ;;  %1721 = vrcp.f32 %v677_v63 }
 0x5cc   :  { %1723 = vrcp.f32 %v674_v10 }
 0x5cf   :  { %v1718_v0 = vpop.eup %1717 }
 0x5d0   :  { %v1720_v3 = vpop.eup %1719  ;;  %v560_v4 = vmul.f32 %v1718_v0, %v1704_v37  ;;  %v795_v5 = vpop.xlane.xlu1 %794  ;;  %v1450_v0 = vld [vmem:[#allocation2 + $0x108] ss:$0 sm:$0xff] }
 0x5d1   :  { %v559_v6 = vmul.f32 %v1720_v3, %v1702_v32  ;;  %v989_v32 = vpack.c.bf16 %v1950_v31, %v1950_v31 }
 0x5d2   :  { %v798_v2 = vpop.xlane.xlu0 %797 }
 0x5d3   :  { %1725 = vrcp.f32 %v798_v2  ;;  %v561_v8 = vpack.c.bf16 %v560_v4, %v559_v6 }
 0x5d4   :  { %1727 = vrcp.f32 %v795_v5  ;;  %v684_v11 = vpop.permute.xlu1 %683 }
 0x5d5   :  { %v1722_v9 = vpop.eup %1721 }
 0x5d6   :  { %v563_v7 = vpop.permute.xlu0 %562  ;;  %v1724_v12 = vpop.eup %1723  ;;  %v681_v13 = vmul.f32 %v1722_v9, %v1708_v45  ;;  %v885_v45 = vld [vmem:[#allocation2 + $0xd8] sm:$0xff] }
 0x5d7   :  { %1572 = vmatpush3.bf16.msra.mxu1 %v563_v7  ;;  %v680_v14 = vmul.f32 %v1724_v12, %v1706_v43  ;;  %v887_v43 = vpack.c.bf16 %v883_v40, %v882_v39 }
 0x5d8   :  { %1583 = vmatprep.subr.bf16.mxu1 %v1769_v1  ;;  %v805_v18 = vpop.permute.xlu1 %804 }
 0x5d9   :  { %v682_v15 = vpack.c.bf16 %v681_v13, %v680_v14  ;;  %1602 = vmatpush3.bf16.msra.mxu0 %v887_v43 }
 0x5da   :  { %1574 = vmatmul.mubr.msk.bf16.vlgmr.msra.gmra.mrb[16].mxu1 %vm124_vm6, %v561_v8  ;;  %1603 = vmatprep.subr.bf16.mxu0 %v1769_v1 }
 0x5db   :  { %1584 = vmatpush3.bf16.msra.mxu1 %v684_v11  ;;  %1585 = vmatprep.mubr.msk.bf16.mxu1 %vm1770_vm5, %v1769_v1 }
 0x5dc   :  { %1595 = vmatprep.subr.bf16.mxu1 %v1769_v1 }
 0x5dd   :  { %v1726_v17 = vpop.eup %1725 }
 0x5de   :  { %v1728_v19 = vpop.eup %1727  ;;  %v802_v20 = vmul.f32 %v1726_v17, %v1712_v49 }
 0x5df   :  { %v801_v23 = vmul.f32 %v1728_v19, %v1925_v47  ;;  %v888_v47 = vpack.c.bf16 %v885_v45, %v884_v44 }
 0x5e1   :  { %v803_v25 = vpack.c.bf16 %v802_v20, %v801_v23  ;;  %1604 = vmatpush3.bf16.msra.mxu0 %v888_v47  ;;  %v1041_v23 = vld [vmem:[#allocation2 + $0x40] sm:$0xff] }
 0x5e2   :  { %1586 = vmatmul.mubr.msk.bf16.vlgmr.msra.gmra.mrb[20].mxu1 %vm124_vm6, %v682_v15  ;;  %1617 = vmatprep.subr.bf16.mxu0 %v1769_v1 }
 0x5e3   :  { %1596 = vmatpush3.bf16.msra.mxu1 %v805_v18  ;;  %1597 = vmatprep.mubr.msk.bf16.mxu1 %vm1770_vm5, %v1769_v1 }
 0x5e4   :  { %1609 = vmatprep.subr.bf16.mxu1 %v1769_v1 }
 0x5ea   :  { %1598 = vmatmul.mubr.msk.bf16.vlgmr.msra.gmra.mrb[24].mxu1 %vm124_vm6, %v803_v25  ;;  %v1093_v25 = vld [vmem:[#allocation2 + $0x110] sm:$0xff] }
 0x5eb   :  { %1610 = vmatpush3.bf16.msra.mxu1 %v990_v24  ;;  %1613 = vmatprep.mubr.msk.bf16.mxu1 %vm1770_vm5, %v1769_v1  ;;  %v1042_v24 = vpack.c.bf16 %v1041_v23, %v1040_v22  ;;  %v1098_v27 = vpack.c.bf16 %v1094_v26, %v1093_v25 }
 0x5ec   :  { %1611 = vmatprep.subr.bf16.mxu1 %v1769_v1 }
 0x5ef   :  { %1612 = vmatpush3.bf16.msra.mxu1 %v991_v30  ;;  %v1096_v30 = vld [vmem:[#allocation2 + $0x128] sm:$0xff] }
 0x5f0   :  { %1623 = vmatprep.subr.bf16.mxu1 %v1769_v1 }
 0x5f2   :  { %1614 = vmatmul.mubr.msk.bf16.vlgmr.msra.gmra.mrb[28].mxu1 %vm65_vm4, %v989_v32  ;;  %v1099_v32 = vpack.c.bf16 %v1096_v30, %v1095_v28 }
 0x5f3   :  { %1627 = vmatprep.mubr.msk.bf16.mxu1 %vm1770_vm5, %v1769_v1  ;;  %1624 = vmatpush3.bf16.msra.mxu1 %v1098_v27 }
 0x5f4   :  { %1625 = vmatprep.subr.bf16.mxu1 %v1769_v1 }
 0x5f7   :  { %1626 = vmatpush3.bf16.msra.mxu1 %v1099_v32 }
 0x5f8   :  { %1639 = vmatprep.subr.bf16.mxu1 %v1769_v1 }
 0x69d   :  { %v480_v33 = vpop.f32.mrb[12].mxu1 }
 0x69e   :  { %v1563_v34 = vpop.f32.mrb[13].mxu1 }
 0x69f   :  { %v483_v35 = vpop.f32.mrb[14].mxu1 }
 0x6a0   :  { %v1564_v36 = vpop.f32.mrb[15].mxu1 }
 0x6ad   :  { %v602_v37 = vpop.f32.mrb[16].mxu1 }
 0x6ae   :  { %v1575_v29 = vpop.f32.mrb[17].mxu1 }
 0x6af   :  { %v605_v38 = vpop.f32.mrb[18].mxu1 }
 0x6b0   :  { %v1680_v41 = vpack.i.bf16 %v605_v38, %v602_v37  ;;  %v1576_v42 = vpop.f32.mrb[19].mxu1 }
 0x6b2   :  { %1681 = vrot.lane.b32.xlu0 %v1680_v41, %s1767_s26 }
 0x6b5   :  { %v723_v46 = vpop.f32.mrb[20].mxu1 }
 0x6b6   :  { %v1587_v48 = vpop.f32.mrb[21].mxu1 }
 0x6b7   :  { %v726_v49 = vpop.f32.mrb[22].mxu1 }
 0x6b8   :  { %v1685_v52 = vpack.i.bf16 %v726_v49, %v723_v46  ;;  %v1588_v53 = vpop.f32.mrb[23].mxu1 }
 0x6ba   :  { %1686 = vrot.lane.b32.xlu1 %v1685_v52, %s1782_s21 }
 0x6bd   :  { %v844_v54 = vpop.f32.mrb[24].mxu1 }
 0x6be   :  { %v1599_v55 = vpop.f32.mrb[25].mxu1 }
 0x6bf   :  { %v847_v56 = vpop.f32.mrb[26].mxu1 }
 0x6c0   :  { %v1690_v57 = vpack.i.bf16 %v847_v56, %v844_v54  ;;  %v1600_v59 = vpop.f32.mrb[27].mxu1 }
 0x6c2   :  { %1691 = vrot.lane.b32.xlu0 %v1690_v57, %s1783_s22 }
 0x6c5   :  { %v1034_v60 = vpop.f32.mrb[28].mxu1 }
 0x6c6   :  { %v1615_v61 = vpop.f32.mrb[29].mxu1  ;;  %v1035_v5 = vadd.f32 %v1450_v0, %v1034_v60 }
 0x6c7   :  { %v1037_v62 = vpop.f32.mrb[30].mxu1 }
 0x6c8   :  { %v1616_v63 = vpop.f32.mrb[31].mxu1  ;;  %v1043_v14 = vpack.c.bf16 %v1035_v5, %v1035_v5 }
 0x6ca   :  { %v1050_v21 = vsel %vm1048_vm9, %v1043_v14, 0  ;;  %v1449_v14 = vld [vmem:[#allocation2 + $0x140] ss:$0 sm:$0xff] }
 0x724   :  { %v1682_v10 = vpop.permute.xlu0 %1681 }
 0x725   :  { %v1684_v3 = vunpack.i.h.bf16 %v1682_v10  ;;  %v1683_v4 = vunpack.i.l.bf16 %v1682_v10 }
 0x727   :  { %v876_v9 = vsel %vm369_vm7, %v483_v35, %v1684_v3  ;;  %v875_v11 = vsel %vm369_vm7, %v480_v33, %v1683_v4  ;;  %v1446_v33 = vld [vmem:[#allocation2 + $0xe0] ss:$0 sm:$0xff] }
 0x72c   :  { %v1687_v2 = vpop.permute.xlu1 %1686 }
 0x72d   :  { %v1689_v6 = vunpack.i.h.bf16 %v1687_v2  ;;  %v1688_v7 = vunpack.i.l.bf16 %v1687_v2 }
 0x72f   :  { %v878_v15 = vsel %vm124_vm6, %v876_v9, %v1689_v6  ;;  %v877_v17 = vsel %vm124_vm6, %v875_v11, %v1688_v7  ;;  %v1448_v9 = vld [vmem:[#allocation2 + $0x138] ss:$0 sm:$0xff] }
 0x734   :  { %v1692_v8 = vpop.permute.xlu0 %1691 }
 0x735   :  { %v1694_v12 = vunpack.i.h.bf16 %v1692_v8  ;;  %v1693_v13 = vunpack.i.l.bf16 %v1692_v8 }
 0x737   :  { %v881_v18 = vsel %vm879_vm8, %v878_v15, %v1694_v12  ;;  %v880_v19 = vsel %vm879_vm8, %v877_v17, %v1693_v13  ;;  %v1453_v12 = vld [vmem:[#allocation2 + $0x130] ss:$0 sm:$0xff] }
 0x738   :  { %v886_v20 = vpack.c.bf16 %v881_v18, %v880_v19 }
 0x73a   :  { %1606 = vmatmul.mubr.msk.bf16.vlgmr.msra.gmra.mrb[24].mxu0 %vm65_vm4, %v886_v20 }
 0x73b   :  { %1618 = vmatpush3.bf16.msra.mxu0 %v1050_v21  ;;  %1619 = vmatprep.mubr.msk.bf16.mxu0 %vm1770_vm5, %v1769_v1 }
 0x73c   :  { %1631 = vmatprep.subr.bf16.mxu0 %v1769_v1 }
 0x742   :  { %1620 = vmatmul.mubr.msk.bf16.vlgmr.msra.gmra.mrb[28].mxu0 %vm1044_vm10, %v1042_v24 }
 0x743   :  { %1635 = vmatprep.mubr.msk.bf16.mxu0 %vm1770_vm5, %v1769_v1 }
 0x80d   :  { %v931_v34 = vpop.f32.mrb[24].mxu0 }
 0x80e   :  { %v932_v35 = vadd.f32 %v1446_v33, %v931_v34  ;;  %v1607_v36 = vpop.f32.mrb[25].mxu0  ;;  %v1195_v34 = vld [vmem:[#allocation2 + $0x168] sm:$0xff] }
 0x80f   :  { %v934_v37 = vpop.f32.mrb[26].mxu0 }
 0x810   :  { %v938_v29 = vadd.f32 %v932_v35, %v1858_v51  ;;  %v935_v38 = vadd.f32 %v1446_v33, %v934_v37  ;;  %v1608_v39 = vpop.f32.mrb[27].mxu0  ;;  %v1196_v35 = vld [vmem:[#allocation2 + $0x170] sm:$0xff]  ;;  %v1197_v37 = vld [vmem:[#allocation2 + $0x178] sm:$0xff] }
 0x811   :  { %v1200_v36 = vpack.c.bf16 %v1196_v35, %v1195_v34  ;;  %v1253_v39 = vld [vmem:[#allocation2 + $0x190] sm:$0xff] }
 0x812   :  { %v939_v40 = vadd.f32 %v935_v38, %v1855_v50  ;;  %v942_v41 = vsel %vm65_vm4, %v938_v29, 0.0  ;;  %v951_v44 = vmul.f32 %v938_v29, %v938_v29 }
 0x813   :  { %943 = vadd.xlane.f32.xlu1 %v942_v41  ;;  %1632 = vmatpush3.bf16.msra.mxu0 %v1200_v36  ;;  %v1255_v41 = vld [vmem:[#allocation2 + $0x1a0] sm:$0xff] }
 0x814   :  { %v945_v42 = vsel %vm65_vm4, %v939_v40, 0.0  ;;  %v952_v43 = vmul.f32 %v939_v40, %v939_v40  ;;  %v953_v51 = vsel %vm65_vm4, %v951_v44, 0.0  ;;  %1633 = vmatprep.subr.bf16.mxu0 %v1769_v1 }
 0x815   :  { %946 = vadd.xlane.f32.xlu0 %v945_v42  ;;  %v1086_v45 = vpop.f32.mrb[28].mxu0 }
 0x816   :  { %v1621_v46 = vpop.f32.mrb[29].mxu0  ;;  %v956_v47 = vsel %vm65_vm4, %v952_v43, 0.0  ;;  %v1256_v43 = vld [vmem:[#allocation2 + $0x1a8] sm:$0xff] }
 0x817   :  { %957 = vadd.xlane.f32.xlu1 %v956_v47  ;;  %v1089_v48 = vpop.f32.mrb[30].mxu0  ;;  %v1263_v44 = vpack.c.bf16 %v1256_v43, %v1255_v41  ;;  %v1362_v43 = vld [vmem:[#allocation2 + $0x1d8] sm:$0xff] }
 0x818   :  { %v1097_v49 = vpack.c.bf16 %v1089_v48, %v1086_v45  ;;  %v1622_v52 = vpop.f32.mrb[31].mxu0 }
 0x819   :  { %954 = vadd.xlane.f32.xlu0 %v953_v51 }
 0x81a   :  { %1628 = vmatmul.mubr.msk.bf16.vlgmr.msra.gmra.mrb[32].mxu1 %vm65_vm4, %v1097_v49 }
 0x81b   :  { %1647 = vmatprep.mubr.msk.bf16.mxu1 %vm1770_vm5, %v1769_v1 }
 0x8a0   :  { %v944_v53 = vpop.xlane.xlu1 %943 }
 0x8a1   :  { %v949_v55 = vmul.f32 0.03125, %v944_v53 }
 0x8a2   :  { %v947_v50 = vpop.xlane.xlu0 %946 }
 0x8a3   :  { %v950_v56 = vmul.f32 0.03125, %v947_v50  ;;  %v961_v60 = vmul.f32 %v949_v55, %v949_v55  ;;  %v965_v4 = vsub.f32 %v938_v29, %v949_v55  ;;  %v1198_v29 = vld [vmem:[#allocation2 + $0x180] sm:$0xff] }
 0x8a4   :  { %v958_v57 = vpop.xlane.xlu1 %957  ;;  %v1201_v38 = vpack.c.bf16 %v1198_v29, %v1197_v37 }
 0x8a5   :  { %v962_v61 = vmul.f32 %v950_v56, %v950_v56  ;;  %v960_v62 = vmul.f32 0.03125, %v958_v57  ;;  %v966_v6 = vsub.f32 %v939_v40, %v950_v56  ;;  %v1254_v40 = vld [vmem:[#allocation2 + $0x198] sm:$0xff] }
 0x8a6   :  { %v955_v54 = vpop.xlane.xlu0 %954  ;;  %1634 = vmatpush3.bf16.msra.mxu0 %v1201_v38  ;;  %v1262_v42 = vpack.c.bf16 %v1254_v40, %v1253_v39 }
 0x8a7   :  { %v959_v59 = vmul.f32 0.03125, %v955_v54  ;;  %v964_v10 = vsub.f32 %v960_v62, %v962_v61  ;;  %1651 = vmatprep.subr.bf16.mxu0 %v1769_v1  ;;  %v1455_v62 = vld [vmem:[#allocation2 + $0x148] ss:$0 sm:$0xff] }
 0x8a8   :  { %1640 = vmatpush3.bf16.msra.mxu1 %v1262_v42 }
 0x8a9   :  { %v963_v63 = vsub.f32 %v959_v59, %v961_v60  ;;  %v968_v2 = vadd.f32 1e-05, %v964_v10  ;;  %1641 = vmatprep.subr.bf16.mxu1 %v1769_v1 }
 0x8ab   :  { %v967_v0 = vadd.f32 1e-05, %v963_v63 }
 0x8ac   :  { %1642 = vmatpush3.bf16.msra.mxu1 %v1263_v44  ;;  %v1363_v44 = vld [vmem:[#allocation2 + $0x1e0] sm:$0xff] }
 0x8ad   :  { %1729 = vrsqrt.f32 %v967_v0  ;;  %1643 = vmatprep.subr.bf16.mxu1 %v1769_v1 }
 0x8ae   :  { %1731 = vrsqrt.f32 %v968_v2 }
 0x8b7   :  { %v1730_v3 = vpop.eup %1729 }
 0x8b8   :  { %v1732_v5 = vpop.eup %1731  ;;  %v971_v7 = vmul.f32 %v1730_v3, %v965_v4  ;;  %v1456_v4 = vld [vmem:[#allocation2 + $0x150] ss:$0 sm:$0xff] }
 0x8b9   :  { %v972_v8 = vmul.f32 %v1732_v5, %v966_v6 }
 0x8ba   :  { %v977_v11 = vmul.f32 %v1448_v9, %v971_v7 }
 0x8bb   :  { %v978_v13 = vmul.f32 %v1448_v9, %v972_v8  ;;  %v1257_v9 = vld [vmem:[#allocation2 + $0x1b0] sm:$0xff] }
 0x8bc   :  { %v983_v17 = vadd.f32 %v1449_v14, %v977_v11  ;;  %v1258_v11 = vld [vmem:[#allocation2 + $0x1b8] sm:$0xff] }
 0x8bd   :  { %v984_v22 = vadd.f32 %v1449_v14, %v978_v13  ;;  %v1259_v13 = vld [vmem:[#allocation2 + $0x1c0] sm:$0xff]  ;;  %v1260_v14 = vld [vmem:[#allocation2 + $0x1c8] sm:$0xff] }
 0x8ed   :  { %v1142_v15 = vpop.f32.mrb[32].mxu1 }
 0x8ee   :  { %v1143_v18 = vadd.f32 %v1453_v12, %v1142_v15  ;;  %v1629_v19 = vpop.f32.mrb[33].mxu1  ;;  %v1265_v15 = vpack.c.bf16 %v1260_v14, %v1259_v13 }
 0x8ef   :  { %v1145_v20 = vpop.f32.mrb[34].mxu1 }
 0x8f0   :  { %v1149_v21 = vadd.f32 %v1143_v18, %v983_v17  ;;  %v1146_v23 = vadd.f32 %v1453_v12, %v1145_v20  ;;  %v1630_v24 = vpop.f32.mrb[35].mxu1  ;;  %v1264_v12 = vpack.c.bf16 %v1258_v11, %v1257_v9  ;;  %v1457_v17 = vld [vmem:[#allocation2 + $0x188] ss:$0 sm:$0xff]  ;;  %v1462_v9 = vld [vmem:[#allocation2 + $0x160] ss:$0 sm:$0xff] }
 0x8f2   :  { %v1150_v25 = vadd.f32 %v1146_v23, %v984_v22  ;;  %v1153_v26 = vsel %vm65_vm4, %v1149_v21, 0.0  ;;  %v1161_v27 = vmul.f32 %v1149_v21, %v1149_v21  ;;  %1644 = vmatpush3.bf16.msra.mxu1 %v1264_v12 }
 0x8f3   :  { %1154 = vadd.xlane.f32.xlu0 %v1153_v26  ;;  %1645 = vmatprep.subr.bf16.mxu1 %v1769_v1 }
 0x8f4   :  { %v1156_v28 = vsel %vm65_vm4, %v1150_v25, 0.0  ;;  %v1162_v30 = vmul.f32 %v1150_v25, %v1150_v25  ;;  %v1163_v32 = vsel %vm65_vm4, %v1161_v27, 0.0  ;;  %v1459_v27 = vld [vmem:[#allocation2 + $0x1d0] ss:$0 sm:$0xff] }
 0x8f5   :  { %1157 = vadd.xlane.f32.xlu1 %v1156_v28 }
 0x8f6   :  { %v1166_v33 = vsel %vm65_vm4, %v1162_v30, 0.0  ;;  %1646 = vmatpush3.bf16.msra.mxu1 %v1265_v15  ;;  %v1463_v15 = vld [vmem:[#allocation2 + $0x1f8] ss:$0 sm:$0xff] }
 0x8f7   :  { %1164 = vadd.xlane.f32.xlu0 %v1163_v32 }
 0x8f9   :  { %1167 = vadd.xlane.f32.xlu1 %v1166_v33 }
 0x980   :  { %v1155_v45 = vpop.xlane.xlu0 %1154 }
 0x981   :  { %v1159_v46 = vmul.f32 0.03125, %v1155_v45  ;;  %v1367_v45 = vpack.c.bf16 %v1363_v44, %v1362_v43 }
 0x982   :  { %v1158_v47 = vpop.xlane.xlu1 %1157 }
 0x983   :  { %v1160_v48 = vmul.f32 0.03125, %v1158_v47  ;;  %v1171_v51 = vmul.f32 %v1159_v46, %v1159_v46  ;;  %v1175_v60 = vsub.f32 %v1149_v21, %v1159_v46  ;;  %v1364_v46 = vld [vmem:[#allocation2 + $0x1e8] sm:$0xff]  ;;  %v1365_v47 = vld [vmem:[#allocation2 + $0x1f0] sm:$0xff] }
 0x984   :  { %v1165_v49 = vpop.xlane.xlu0 %1164 }
 0x985   :  { %v1169_v52 = vmul.f32 0.03125, %v1165_v49  ;;  %v1172_v53 = vmul.f32 %v1160_v48, %v1160_v48  ;;  %v1176_v63 = vsub.f32 %v1150_v25, %v1160_v48  ;;  %v1368_v48 = vpack.c.bf16 %v1365_v47, %v1364_v46 }
 0x986   :  { %v1168_v50 = vpop.xlane.xlu1 %1167 }
 0x987   :  { %v1173_v54 = vsub.f32 %v1169_v52, %v1171_v51  ;;  %v1170_v55 = vmul.f32 0.03125, %v1168_v50 }
 0x989   :  { %v1177_v56 = vadd.f32 1e-05, %v1173_v54  ;;  %v1174_v57 = vsub.f32 %v1170_v55, %v1172_v53 }
 0x98b   :  { %1733 = vrsqrt.f32 %v1177_v56  ;;  %v1178_v59 = vadd.f32 1e-05, %v1174_v57 }
 0x98d   :  { %1735 = vrsqrt.f32 %v1178_v59 }
 0x995   :  { %v1734_v61 = vpop.eup %1733 }
 0x996   :  { %v1181_v10 = vmul.f32 %v1734_v61, %v1175_v60 }
 0x997   :  { %v1736_v0 = vpop.eup %1735 }
 0x998   :  { %v1182_v2 = vmul.f32 %v1736_v0, %v1176_v63  ;;  %v1187_v3 = vmul.f32 %v1455_v62, %v1181_v10 }
 0x99a   :  { %v1188_v5 = vmul.f32 %v1455_v62, %v1182_v2  ;;  %v1193_v6 = vadd.f32 %v1456_v4, %v1187_v3 }
 0x99c   :  { %v1194_v7 = vadd.f32 %v1456_v4, %v1188_v5  ;;  %v1461_v4 = vld [vmem:[#allocation2 + $0x158] ss:$0 sm:$0xff] }
 0x99e   :  { %v1199_v8 = vpack.c.bf16 %v1194_v7, %v1193_v6 }
 0x9a0   :  { %1636 = vmatmul.mubr.msk.bf16.vlgmr.msra.gmra.mrb[32].mxu0 %vm65_vm4, %v1199_v8 }
 0x9a1   :  { %1655 = vmatprep.mubr.msk.bf16.mxu0 %vm1770_vm5, %v1769_v1  ;;  %1652 = vmatpush3.bf16.msra.mxu0 %v1367_v45 }
 0x9a2   :  { %1653 = vmatprep.subr.bf16.mxu0 %v1769_v1 }
 0x9a5   :  { %1654 = vmatpush3.bf16.msra.mxu0 %v1368_v48 }
 0xa73   :  { %v1244_v18 = vpop.f32.mrb[32].mxu0 }
 0xa74   :  { %v1245_v19 = vadd.f32 %v1457_v17, %v1244_v18  ;;  %v1637_v20 = vpop.f32.mrb[33].mxu0 }
 0xa75   :  { %v1247_v21 = vpop.f32.mrb[34].mxu0 }
 0xa76   :  { %v1248_v22 = vadd.f32 %v1457_v17, %v1247_v21  ;;  %v1638_v23 = vpop.f32.mrb[35].mxu0  ;;  %v1251_v24 = vmax.f32 %v1245_v19, 0.0 }
 0xa78   :  { %v1252_v25 = vmax.f32 %v1248_v22, 0.0 }
 0xa7a   :  { %v1261_v26 = vpack.c.bf16 %v1252_v25, %v1251_v24 }
 0xa7c   :  { %1648 = vmatmul.mubr.msk.bf16.vlgmr.msra.gmra.mrb[36].mxu1 %vm1271_vm11, %v1261_v26 }
 0xb4f   :  { %v1309_v28 = vpop.f32.mrb[36].mxu1 }
 0xb50   :  { %v1310_v30 = vadd.f32 %v1459_v27, %v1309_v28  ;;  %v1649_v32 = vpop.f32.mrb[37].mxu1 }
 0xb51   :  { %v1312_v33 = vpop.f32.mrb[38].mxu1 }
 0xb52   :  { %v1316_v34 = vadd.f32 %v1310_v30, %v1193_v6  ;;  %v1313_v35 = vadd.f32 %v1459_v27, %v1312_v33  ;;  %v1650_v36 = vpop.f32.mrb[39].mxu1 }
 0xb54   :  { %v1317_v37 = vadd.f32 %v1313_v35, %v1194_v7  ;;  %v1320_v29 = vsel %vm65_vm4, %v1316_v34, 0.0  ;;  %v1328_v38 = vmul.f32 %v1316_v34, %v1316_v34 }
 0xb55   :  { %1321 = vadd.xlane.f32.xlu0 %v1320_v29 }
 0xb56   :  { %v1323_v39 = vsel %vm65_vm4, %v1317_v37, 0.0  ;;  %v1329_v40 = vmul.f32 %v1317_v37, %v1317_v37  ;;  %v1330_v41 = vsel %vm65_vm4, %v1328_v38, 0.0 }
 0xb57   :  { %1324 = vadd.xlane.f32.xlu1 %v1323_v39 }
 0xb58   :  { %v1333_v42 = vsel %vm65_vm4, %v1329_v40, 0.0 }
 0xb59   :  { %1331 = vadd.xlane.f32.xlu0 %v1330_v41 }
 0xb5b   :  { %1334 = vadd.xlane.f32.xlu1 %v1333_v42 }
 0xb6c   :  { %290 = vrot.lane.b32.xlu1 %v1950_v31, %s1782_s21 }
 0xb6f   :  { %286 = vrot.lane.b32.xlu0 %v1866_v58, %s1782_s21 }
 0xbe2   :  { %v1322_v49 = vpop.xlane.xlu0 %1321 }
 0xbe3   :  { %v1326_v51 = vmul.f32 0.03125, %v1322_v49 }
 0xbe4   :  { %v1325_v52 = vpop.xlane.xlu1 %1324 }
 0xbe5   :  { %v1327_v50 = vmul.f32 0.03125, %v1325_v52  ;;  %v1338_v54 = vmul.f32 %v1326_v51, %v1326_v51  ;;  %v1342_v2 = vsub.f32 %v1316_v34, %v1326_v51 }
 0xbe6   :  { %v1332_v53 = vpop.xlane.xlu0 %1331 }
 0xbe7   :  { %v1336_v31 = vmul.f32 0.03125, %v1332_v53  ;;  %v1339_v56 = vmul.f32 %v1327_v50, %v1327_v50  ;;  %v1343_v5 = vsub.f32 %v1317_v37, %v1327_v50 }
 0xbe8   :  { %v1335_v55 = vpop.xlane.xlu1 %1334 }
 0xbe9   :  { %v1340_v58 = vsub.f32 %v1336_v31, %v1338_v54  ;;  %v1337_v57 = vmul.f32 0.03125, %v1335_v55 }
 0xbea   :  { %v287_v59 = vpop.permute.xlu0 %286 }
 0xbeb   :  { %v1344_v60 = vadd.f32 1e-05, %v1340_v58  ;;  %v1341_v61 = vsub.f32 %v1337_v57, %v1339_v56  ;;  %v293_v62 = vsel %vm124_vm6, %v1880_v16, %v287_v59 }
 0xbec   :  { %v291_v1 = vpop.permute.xlu1 %290 }
 0xbed   :  { %1737 = vrsqrt.f32 %v1344_v60  ;;  %v1345_v63 = vadd.f32 1e-05, %v1341_v61  ;;  %v295_v10 = vsel %vm294_vm12, %v293_v62, %v291_v1 }
 0xbee   :  { %v297_v0 = vsel %vm296_vm13, %v295_v10, 0.0 }
 0xbef   :  { %1739 = vrsqrt.f32 %v1345_v63  ;;  %299 = vst.msk [vmem:[%s2021_s4] sm:$0x3] %vm298_vm14, %v297_v0 }
 0xbf7   :  { %v1738_v3 = vpop.eup %1737 }
 0xbf8   :  { %v1348_v6 = vmul.f32 %v1738_v3, %v1342_v2 }
 0xbf9   :  { %v1740_v7 = vpop.eup %1739 }
 0xbfa   :  { %v1349_v8 = vmul.f32 %v1740_v7, %v1343_v5  ;;  %v1354_v16 = vmul.f32 %v1461_v4, %v1348_v6 }
 0xbfc   :  { %v1355_v11 = vmul.f32 %v1461_v4, %v1349_v8  ;;  %v1360_v12 = vadd.f32 %v1462_v9, %v1354_v16 }
 0xbfe   :  { %v1361_v13 = vadd.f32 %v1462_v9, %v1355_v11 }
 0xc00   :  { %v1366_v14 = vpack.c.bf16 %v1361_v13, %v1360_v12 }
 0xc02   :  { %1656 = vmatmul.mubr.msk.bf16.vlgmr.msra.gmra.mrb[36].mxu0 %vm65_vm4, %v1366_v14 }
 0xcd5   :  { %v1411_v17 = vpop.f32.mrb[36].mxu0 }
 0xcd6   :  { %v1412_v18 = vadd.f32 %v1463_v15, %v1411_v17  ;;  %v1657_v19 = vpop.f32.mrb[37].mxu0 }
 0xcd7   :  { %v1414_v20 = vpop.f32.mrb[38].mxu0 }
 0xcd8   :  { %1418 = vst [vmem:[%s2020_s3] sm:$0xff] %v1412_v18  ;;  %v1415_v21 = vadd.f32 %v1463_v15, %v1414_v20  ;;  %v1658_v22 = vpop.f32.mrb[39].mxu0 }
 0xcda   :  { %1419 = vst [vmem:[%s2020_s3 + $0x8] sm:$0xff] %v1415_v21 }
 0xcdb   :  { %1428 = vsyncpa [#allocation3], 1 }

</bundles_post_ra>
